<compile_context>
chip_gen: v6e
topology: v6e:2x2x1
jax: 0.10.0
libtpu: 0.0.40
codegen_flags: <defaults>
</compile_context>

<pallas_src>
import numpy as np
import jax
import jax.numpy as jnp
from jax import lax
from jax.experimental import pallas as pl
from jax.experimental.pallas import tpu as pltpu

# ---- small synthetic config (real t5-v1_1-xxl: B=1, L=77->128, D=4096, H=64, DK=64, DFF=10240) ----
B = 2          # batch
L = 8          # sequence length
D = 32         # d_model
H = 4          # num attention heads
DK = 8         # d_kv per head
HDK = H * DK   # inner dim
DFF = 64       # d_ff

HEADS_PER_GROUP = 2            # real scale: 2 heads * DK=64 -> 128-lane q/k/v slices & o stores
NHG = H // HEADS_PER_GROUP     # number of attention head-group steps
GD = HEADS_PER_GROUP * DK      # columns per head group

TILE_FF = 64                   # real scale: <=512 on v7x, 1024 on v6e, multiple of 128 on v5e
NK = DFF // TILE_FF            # number of FF (DFF) reduction steps
NSTEPS = NHG + NK              # single sequential phase axis: [head groups | FF tiles]

BL = B * L                     # batch folded into the matmul M dimension
EPS = 1e-6                     # T5LayerNorm epsilon
_SQRT_2_OVER_PI = 0.7978845608028654

# Explicit scoped-VMEM budget (default is only 16/32 MiB). Keep <= 64 MiB so the same
# setting is safe on v7x; raise to ~100 MiB on v5e/v6e for bigger TILE_FF.
VMEM_LIMIT_BYTES = 64 * 1024 * 1024

assert H % HEADS_PER_GROUP == 0 and DFF % TILE_FF == 0


def _rms_norm(x, w):
    # T5LayerNorm: no mean subtraction, no bias, fp32 math
    var = jnp.mean(x * x, axis=-1, keepdims=True)
    return x * lax.rsqrt(var + EPS) * w


def _new_gelu(g):
    # NewGELU (tanh approximation) in fp32 (v5e-safe; on v6e/v7x bf16 is an option)
    return 0.5 * g * (1.0 + jnp.tanh(_SQRT_2_OVER_PI * (g + 0.044715 * g * g * g)))


def t5_block0_kernel(x_ref, bias_ref, ln1_ref, wqkv_ref, wo_ref, ln2_ref,
                     wi01_ref, wffo_ref, out_ref,
                     xn_sc, qkv_sc, o_sc, h1_sc, hn_sc, *acc):
    i = pl.program_id(0)  # phase index: [0, NHG) attention head groups, [NHG, NHG+NK) FF tiles

    # ---------------- step 0: RMS-norm the input once, seed the residual ----------------
    @pl.when(i == 0)
    def _init():
        x2d = x_ref[...].reshape(BL, D)                                   # (B*L, D) fp32
        xn_sc[...] = _rms_norm(x2d, ln1_ref[...]).astype(jnp.bfloat16)
        h1_sc[...] = x2d                                                  # residual seed

    # ---------------- phase 1: one attention head group per grid step ----------------
    @pl.when(i < NHG)
    def _attn_group():
        # Fused q|k|v matmul for this head group, all batches at once (M = B*L rows),
        # written to a VMEM scratch so the result is not a huge live traced value.
        qkv_sc[...] = jnp.dot(xn_sc[...], wqkv_ref[0],
                              preferred_element_type=jnp.float32).astype(jnp.bfloat16)

        # NOTE: T5 applies NO 1/sqrt(d_k) scaling; the zero attention mask `t` is
        # ignored because position_bias is supplied (HF T5Attention behavior).
        for b in range(B):              # B is tiny (SD3 text encoder: 1-2)
            r0 = b * L
            outs = []
            for hh in range(HEADS_PER_GROUP):
                c0 = hh * DK
                q_h = qkv_sc[r0:r0 + L, c0:c0 + DK]                       # (L, DK) bf16
                k_h = qkv_sc[r0:r0 + L, GD + c0:GD + c0 + DK]
                v_h = qkv_sc[r0:r0 + L, 2 * GD + c0:2 * GD + c0 + DK]
                # contract last axes of both operands -> no explicit K transpose
                s = lax.dot_general(q_h, k_h, (((1,), (1,)), ((), ())),
                                    preferred_element_type=jnp.float32)   # (L, L) fp32
                s = s + bias_ref[0, hh]                                   # relative position bias
                m = jnp.max(s, axis=-1, keepdims=True)
                p = jnp.exp(s - m)                                        # unnormalized probs
                denom = jnp.sum(p, axis=-1, keepdims=True)                # (L, 1)
                o_h = jnp.dot(p.astype(jnp.bfloat16), v_h,
                              preferred_element_type=jnp.float32)         # (L, DK)
                # normalize AFTER p@v (L*DK values, not L*L); approx recip -> EUP slot
                outs.append(o_h * pl.reciprocal(denom, approx=True))
            # one group-wide store per batch (128 lanes at real scale: 2 heads * DK=64)
            o_sc[r0:r0 + L, :] = jnp.concatenate(outs, axis=-1)

        # single output-projection partial for the whole head group, all batches at once
        h1_sc[...] += jnp.dot(o_sc[...].astype(jnp.bfloat16), wo_ref[0],
                              preferred_element_type=jnp.float32)

    # ---------------- after the last head group: residual done -> second RMS norm ----------------
    @pl.when(i == NHG - 1)
    def _post_attn():
        hn_sc[...] = _rms_norm(h1_sc[...], ln2_ref[...]).astype(jnp.bfloat16)
        if NK > 1:                       # trace-time: only allocate/zero the FF accumulator if needed
            acc[0][...] = jnp.zeros_like(acc[0])

    # ---------------- phase 2: gated-gelu FF, one DFF tile per grid step ----------------
    @pl.when(i >= NHG)
    def _ff_tile():
        # fused gate|linear slab: one (B*L, D) x (D, 2*TILE_FF) matmul feeds both branches
        gl = jnp.dot(hn_sc[...], wi01_ref[0], preferred_element_type=jnp.float32)
        g = _new_gelu(gl[:, :TILE_FF])
        ff = jnp.dot((g * gl[:, TILE_FF:]).astype(jnp.bfloat16), wffo_ref[0],
                     preferred_element_type=jnp.float32)                  # (B*L, D)
        if NK == 1:
            # fast path: no zero-init, no accumulate, no extra finalize add
            out_ref[...] = (h1_sc[...] + ff).reshape(B, L, D).astype(out_ref.dtype)
        else:
            acc[0][...] += ff

    if NK > 1:
        @pl.when(i == NSTEPS - 1)
        def _finalize():
            out_ref[...] = (h1_sc[...] + acc[0][...]).reshape(B, L, D).astype(out_ref.dtype)


def _prep_params(p):
    """Fuse / group / quantize weights on the wrapper side (bf16 MXU operands)."""
    def grp_cols(w):  # (D, H*DK) -> (NHG, D, HG*DK): heads grouped along columns
        return w.reshape(D, NHG, GD).transpose(1, 0, 2)

    # per-head-group fused [q | k | v] slab: (NHG, D, 3*HG*DK)
    wqkv = jnp.concatenate([grp_cols(p["wq"]), grp_cols(p["wk"]), grp_cols(p["wv"])],
                           axis=-1).astype(jnp.bfloat16)
    # per-head-group output-projection rows: (NHG, HG*DK, D)
    wo = p["wo"].reshape(NHG, GD, D).astype(jnp.bfloat16)
    # per-DFF-tile fused gate|linear slab: (NK, D, 2*TILE_FF)
    wi0_t = p["wi0"].reshape(D, NK, TILE_FF).transpose(1, 0, 2)
    wi1_t = p["wi1"].reshape(D, NK, TILE_FF).transpose(1, 0, 2)
    wi01 = jnp.concatenate([wi0_t, wi1_t], axis=-1).astype(jnp.bfloat16)
    # per-DFF-tile FF output projection: (NK, TILE_FF, D)
    wffo = p["wffo"].reshape(NK, TILE_FF, D).astype(jnp.bfloat16)
    return wqkv, wo, wi01, wffo


def t5_block0(x, pos_bias, p):
    wqkv, wo, wi01, wffo = _prep_params(p)
    bias_bf16 = pos_bias.astype(jnp.bfloat16)   # per-head-group streamed, half VMEM footprint

    in_specs = [
        # x: whole (B, L, D) block — tiny at SD3 scale (B<=2, L<=128), batch folded into M
        pl.BlockSpec((B, L, D), lambda i: (0, 0, 0)),
        # position bias: per-head-group tile, bf16
        pl.BlockSpec((1, HEADS_PER_GROUP, L, L),
                     lambda i: (0, jnp.minimum(i, NHG - 1), 0, 0)),
        pl.BlockSpec((1, D), lambda i: (0, 0)),                            # ln1 weight
        # fused Wq|Wk|Wv head-group slab (streamed + double-buffered across head groups)
        pl.BlockSpec((1, D, 3 * GD), lambda i: (jnp.minimum(i, NHG - 1), 0, 0)),
        # Wo head-group slab (rows for this head group)
        pl.BlockSpec((1, GD, D), lambda i: (jnp.minimum(i, NHG - 1), 0, 0)),
        pl.BlockSpec((1, D), lambda i: (0, 0)),                            # ln2 weight
        # fused wi_0|wi_1 DFF tile (streamed exactly once total — no per-batch re-stream)
        pl.BlockSpec((1, D, 2 * TILE_FF), lambda i: (jnp.maximum(i - NHG, 0), 0, 0)),
        # FF output-projection DFF tile
        pl.BlockSpec((1, TILE_FF, D), lambda i: (jnp.maximum(i - NHG, 0), 0, 0)),
    ]

    scratch_shapes = [
        pltpu.VMEM((BL, D), jnp.bfloat16),        # xn = RMSNorm(x), reused by all head groups
        pltpu.VMEM((BL, 3 * GD), jnp.bfloat16),   # per-group fused qkv (bounds live ranges)
        pltpu.VMEM((BL, GD), jnp.float32),        # per-group head-output concat buffer
        pltpu.VMEM((BL, D), jnp.float32),         # h1 = x + attention (residual accumulator)
        pltpu.VMEM((BL, D), jnp.bfloat16),        # hn = RMSNorm(h1), reused by all FF tiles
    ]
    if NK > 1:
        scratch_shapes.append(pltpu.VMEM((BL, D), jnp.float32))   # FF accumulator

    return pl.pallas_call(
        t5_block0_kernel,
        out_shape=jax.ShapeDtypeStruct((B, L, D), jnp.float32),
        grid=(NSTEPS,),
        in_specs=in_specs,
        out_specs=pl.BlockSpec((B, L, D), lambda i: (0, 0, 0)),
        scratch_shapes=scratch_shapes,
        # single sequential phase axis (weights of each phase stream through it);
        # on v7x with batch 1, a further DFF split across the two TensorCores would
        # require partial-accumulator combination and is intentionally not done here.
        compiler_params=pltpu.CompilerParams(
            dimension_semantics=("arbitrary",),
            vmem_limit_bytes=VMEM_LIMIT_BYTES),
    )(x, bias_bf16, p["ln1"], wqkv, wo, p["ln2"], wi01, wffo)


def t5_block0_ref(x, pos_bias, p):
    """Pure-JAX fp32 reference for correctness checking."""
    def rms(y, w):
        var = jnp.mean(y * y, axis=-1, keepdims=True)
        return y * lax.rsqrt(var + EPS) * w

    xn = rms(x, p["ln1"][0])
    q = (xn @ p["wq"]).reshape(B, L, H, DK).transpose(0, 2, 1, 3)
    k = (xn @ p["wk"]).reshape(B, L, H, DK).transpose(0, 2, 1, 3)
    v = (xn @ p["wv"]).reshape(B, L, H, DK).transpose(0, 2, 1, 3)
    scores = jnp.einsum("bhqd,bhkd->bhqk", q, k) + pos_bias
    attn = jax.nn.softmax(scores, axis=-1)
    o = jnp.einsum("bhqk,bhkd->bhqd", attn, v).transpose(0, 2, 1, 3).reshape(B, L, HDK)
    h1 = x + o @ p["wo"]
    hn = rms(h1, p["ln2"][0])
    g = hn @ p["wi0"]
    g = 0.5 * g * (1.0 + jnp.tanh(_SQRT_2_OVER_PI * (g + 0.044715 * g ** 3)))
    ff = (g * (hn @ p["wi1"])) @ p["wffo"]
    return h1 + ff


if __name__ == "__main__":
    key = jax.random.PRNGKey(0)
    ks = jax.random.split(key, 12)
    s = 0.08
    params = {
        "ln1":  1.0 + 0.1 * jax.random.normal(ks[0], (1, D), jnp.float32),
        "wq":   s * jax.random.normal(ks[1], (D, HDK), jnp.float32),
        "wk":   s * jax.random.normal(ks[2], (D, HDK), jnp.float32),
        "wv":   s * jax.random.normal(ks[3], (D, HDK), jnp.float32),
        "wo":   s * jax.random.normal(ks[4], (HDK, D), jnp.float32),
        "ln2":  1.0 + 0.1 * jax.random.normal(ks[5], (1, D), jnp.float32),
        "wi0":  s * jax.random.normal(ks[6], (D, DFF), jnp.float32),
        "wi1":  s * jax.random.normal(ks[7], (D, DFF), jnp.float32),
        "wffo": s * jax.random.normal(ks[8], (DFF, D), jnp.float32),
    }
    x = jax.random.normal(ks[9], (B, L, D), jnp.float32)
    pos_bias = 0.5 * jax.random.normal(ks[10], (1, H, L, L), jnp.float32)
    # The attention mask `t` is all zeros in the original script and is ignored by
    # HF T5Attention when position_bias is supplied, so it is not a kernel input.

    out = jax.block_until_ready(t5_block0(x, pos_bias, params))
    ref = t5_block0_ref(x, pos_bias, params)
    assert out.shape == (B, L, D)
    # bf16 matmul operands / bf16 bias with fp32 accumulation, approx reciprocal in softmax
    # -> bf16-level tolerance vs the fp32 reference.
    np.testing.assert_allclose(np.asarray(out), np.asarray(ref), rtol=2e-2, atol=2e-2)
    print("KERNEL_OK")
</pallas_src>

<mosaic_0001>
module attributes {stable_mosaic.version = 11 : i64} {
  func.func @t5_block0_kernel(%arg0: i32, %arg1: memref<2x8x32xf32, #tpu.memory_space<vmem>>, %arg2: memref<1x2x8x8xbf16, #tpu.memory_space<vmem>>, %arg3: memref<1x32xf32, #tpu.memory_space<vmem>>, %arg4: memref<1x32x48xbf16, #tpu.memory_space<vmem>>, %arg5: memref<1x16x32xbf16, #tpu.memory_space<vmem>>, %arg6: memref<1x32xf32, #tpu.memory_space<vmem>>, %arg7: memref<1x32x128xbf16, #tpu.memory_space<vmem>>, %arg8: memref<1x64x32xbf16, #tpu.memory_space<vmem>>, %arg9: memref<2x8x32xf32, #tpu.memory_space<vmem>>, %arg10: memref<16x32xbf16, #tpu.memory_space<vmem>>, %arg11: memref<16x48xbf16, #tpu.memory_space<vmem>>, %arg12: memref<16x16xf32, #tpu.memory_space<vmem>>, %arg13: memref<16x32xf32, #tpu.memory_space<vmem>>, %arg14: memref<16x32xbf16, #tpu.memory_space<vmem>>) attributes {dimension_semantics = [#tpu.dimension_semantics<arbitrary>], iteration_bounds = array<i64: 3>, scalar_prefetch = 0 : i64, scratch_operands = 5 : i64, tpu.core_type = #tpu.core_type<tc>, window_params = [{pipeline_mode = #tpu.pipeline_mode<synchronous>, transform_indices = @transform_0, window_bounds = array<i64: 2, 8, 32>}, {transform_indices = @transform_1, window_bounds = array<i64: 1, 2, 8, 8>}, {pipeline_mode = #tpu.pipeline_mode<synchronous>, transform_indices = @transform_2, window_bounds = array<i64: 1, 32>}, {transform_indices = @transform_3, window_bounds = array<i64: 1, 32, 48>}, {transform_indices = @transform_4, window_bounds = array<i64: 1, 16, 32>}, {pipeline_mode = #tpu.pipeline_mode<synchronous>, transform_indices = @transform_5, window_bounds = array<i64: 1, 32>}, {transform_indices = @transform_6, window_bounds = array<i64: 1, 32, 128>}, {transform_indices = @transform_7, window_bounds = array<i64: 1, 64, 32>}, {pipeline_mode = #tpu.pipeline_mode<synchronous>, transform_indices = @transform_8, window_bounds = array<i64: 2, 8, 32>}]} {
    %c0_i32 = arith.constant 0 : i32
    %0 = arith.cmpi eq, %arg0, %c0_i32 : i32
    %1 = arith.extui %0 : i1 to i32
    %c0_i32_0 = arith.constant 0 : i32
    %2 = arith.cmpi ne, %1, %c0_i32_0 : i32
    scf.if %2 {
      %c0 = arith.constant 0 : index
      %c0_5 = arith.constant 0 : index
      %c0_6 = arith.constant 0 : index
      %12 = vector.load %arg1[%c0, %c0_5, %c0_6] : memref<2x8x32xf32, #tpu.memory_space<vmem>>, vector<2x8x32xf32>
      %13 = vector.shape_cast %12 : vector<2x8x32xf32> to vector<16x32xf32>
      %c0_7 = arith.constant 0 : index
      %c0_8 = arith.constant 0 : index
      %14 = vector.load %arg3[%c0_7, %c0_8] : memref<1x32xf32, #tpu.memory_space<vmem>>, vector<1x32xf32>
      %15 = arith.mulf %13, %13 : vector<16x32xf32>
      %cst = arith.constant dense<0.000000e+00> : vector<16xf32>
      %16 = vector.multi_reduction <add>, %15, %cst [1] : vector<16x32xf32> to vector<16xf32>
      %17 = vector.shape_cast %16 : vector<16xf32> to vector<16x1xf32>
      %cst_9 = arith.constant 3.200000e+01 : f32
      %18 = vector.broadcast %cst_9 : f32 to vector<16x1xf32>
      %19 = arith.divf %17, %18 : vector<16x1xf32>
      %cst_10 = arith.constant 9.99999997E-7 : f32
      %20 = vector.broadcast %cst_10 : f32 to vector<16x1xf32>
      %21 = arith.addf %19, %20 : vector<16x1xf32>
      %22 = math.rsqrt %21 : vector<16x1xf32>
      %23 = vector.broadcast %22 : vector<16x1xf32> to vector<16x32xf32>
      %24 = arith.mulf %13, %23 : vector<16x32xf32>
      %25 = vector.broadcast %14 : vector<1x32xf32> to vector<16x32xf32>
      %26 = arith.mulf %24, %25 : vector<16x32xf32>
      %27 = arith.truncf %26 : vector<16x32xf32> to vector<16x32xbf16>
      %c0_11 = arith.constant 0 : index
      %c0_12 = arith.constant 0 : index
      %28 = vector.load %arg10[%c0_11, %c0_12] : memref<16x32xbf16, #tpu.memory_space<vmem>>, vector<16x32xbf16>
      tpu.vector_store %arg10[%c0_11, %c0_12], %27 {strides = array<i32>} : memref<16x32xbf16, #tpu.memory_space<vmem>>, vector<16x32xbf16>,
      %c0_13 = arith.constant 0 : index
      %c0_14 = arith.constant 0 : index
      %29 = vector.load %arg13[%c0_13, %c0_14] : memref<16x32xf32, #tpu.memory_space<vmem>>, vector<16x32xf32>
      tpu.vector_store %arg13[%c0_13, %c0_14], %13 {strides = array<i32>} : memref<16x32xf32, #tpu.memory_space<vmem>>, vector<16x32xf32>,
    } else {
    }
    %c2_i32 = arith.constant 2 : i32
    %3 = arith.cmpi slt, %arg0, %c2_i32 : i32
    %4 = arith.extui %3 : i1 to i32
    %c0_i32_1 = arith.constant 0 : i32
    %5 = arith.cmpi ne, %4, %c0_i32_1 : i32
    scf.if %5 {
      %c0 = arith.constant 0 : index
      %c0_5 = arith.constant 0 : index
      %12 = vector.load %arg10[%c0, %c0_5] : memref<16x32xbf16, #tpu.memory_space<vmem>>, vector<16x32xbf16>
      %c0_6 = arith.constant 0 : index
      %c0_7 = arith.constant 0 : index
      %c0_8 = arith.constant 0 : index
      %13 = vector.load %arg4[%c0_6, %c0_7, %c0_8] : memref<1x32x48xbf16, #tpu.memory_space<vmem>>, vector<1x32x48xbf16>
      %14 = vector.shape_cast %13 : vector<1x32x48xbf16> to vector<32x48xbf16>
      %cst = arith.constant dense<0.000000e+00> : vector<16x48xf32>
      %15 = tpu.matmul %12, %14, %cst {dimension_numbers = #tpu.dot_dimension_numbers<[1], [0], [0], [1], [0, 0, 1, 1], [], []>} : vector<16x32xbf16>, vector<32x48xbf16>, vector<16x48xf32> -> vector<16x48xf32>
      %16 = arith.truncf %15 : vector<16x48xf32> to vector<16x48xbf16>
      %c0_9 = arith.constant 0 : index
      %c0_10 = arith.constant 0 : index
      %17 = vector.load %arg11[%c0_9, %c0_10] : memref<16x48xbf16, #tpu.memory_space<vmem>>, vector<16x48xbf16>
      tpu.vector_store %arg11[%c0_9, %c0_10], %16 {strides = array<i32>} : memref<16x48xbf16, #tpu.memory_space<vmem>>, vector<16x48xbf16>,
      %c0_11 = arith.constant 0 : index
      %c0_12 = arith.constant 0 : index
      %18 = vector.load %arg11[%c0_11, %c0_12] : memref<16x48xbf16, #tpu.memory_space<vmem>>, vector<8x8xbf16>
      %c0_13 = arith.constant 0 : index
      %c16 = arith.constant 16 : index
      %19 = vector.load %arg11[%c0_13, %c16] : memref<16x48xbf16, #tpu.memory_space<vmem>>, vector<8x8xbf16>
      %c0_14 = arith.constant 0 : index
      %c32 = arith.constant 32 : index
      %20 = vector.load %arg11[%c0_14, %c32] : memref<16x48xbf16, #tpu.memory_space<vmem>>, vector<8x8xbf16>
      %cst_15 = arith.constant dense<0.000000e+00> : vector<8x8xf32>
      %21 = tpu.matmul %18, %19, %cst_15 {dimension_numbers = #tpu.dot_dimension_numbers<[1], [1], [0], [0], [0, 0, 1, 0], [], []>} : vector<8x8xbf16>, vector<8x8xbf16>, vector<8x8xf32> -> vector<8x8xf32>
      %c0_16 = arith.constant 0 : index
      %c0_17 = arith.constant 0 : index
      %c0_18 = arith.constant 0 : index
      %c0_19 = arith.constant 0 : index
      %22 = vector.load %arg2[%c0_16, %c0_17, %c0_18, %c0_19] : memref<1x2x8x8xbf16, #tpu.memory_space<vmem>>, vector<1x1x8x8xbf16>
      %23 = vector.shape_cast %22 : vector<1x1x8x8xbf16> to vector<8x8xbf16>
      %24 = arith.extf %23 : vector<8x8xbf16> to vector<8x8xf32>
      %25 = arith.addf %21, %24 : vector<8x8xf32>
      %cst_20 = arith.constant dense<0xFF800000> : vector<8xf32>
      %26 = vector.multi_reduction <maximumf>, %25, %cst_20 [1] : vector<8x8xf32> to vector<8xf32>
      %27 = vector.shape_cast %26 : vector<8xf32> to vector<8x1xf32>
      %28 = vector.broadcast %27 : vector<8x1xf32> to vector<8x8xf32>
      %29 = arith.subf %25, %28 : vector<8x8xf32>
      %30 = math.exp %29 : vector<8x8xf32>
      %cst_21 = arith.constant dense<0.000000e+00> : vector<8xf32>
      %31 = vector.multi_reduction <add>, %30, %cst_21 [1] : vector<8x8xf32> to vector<8xf32>
      %32 = vector.shape_cast %31 : vector<8xf32> to vector<8x1xf32>
      %33 = arith.truncf %30 : vector<8x8xf32> to vector<8x8xbf16>
      %cst_22 = arith.constant dense<0.000000e+00> : vector<8x8xf32>
      %34 = tpu.matmul %33, %20, %cst_22 {dimension_numbers = #tpu.dot_dimension_numbers<[1], [0], [0], [1], [0, 0, 1, 1], [], []>} : vector<8x8xbf16>, vector<8x8xbf16>, vector<8x8xf32> -> vector<8x8xf32>
      %35 = tpu.reciprocal %32 {approx = true} : vector<8x1xf32> -> vector<8x1xf32>
      %36 = vector.broadcast %35 : vector<8x1xf32> to vector<8x8xf32>
      %37 = arith.mulf %34, %36 : vector<8x8xf32>
      %c0_23 = arith.constant 0 : index
      %c8 = arith.constant 8 : index
      %38 = vector.load %arg11[%c0_23, %c8] : memref<16x48xbf16, #tpu.memory_space<vmem>>, vector<8x8xbf16>
      %c0_24 = arith.constant 0 : index
      %c24 = arith.constant 24 : index
      %39 = vector.load %arg11[%c0_24, %c24] : memref<16x48xbf16, #tpu.memory_space<vmem>>, vector<8x8xbf16>
      %c0_25 = arith.constant 0 : index
      %c40 = arith.constant 40 : index
      %40 = vector.load %arg11[%c0_25, %c40] : memref<16x48xbf16, #tpu.memory_space<vmem>>, vector<8x8xbf16>
      %cst_26 = arith.constant dense<0.000000e+00> : vector<8x8xf32>
      %41 = tpu.matmul %38, %39, %cst_26 {dimension_numbers = #tpu.dot_dimension_numbers<[1], [1], [0], [0], [0, 0, 1, 0], [], []>} : vector<8x8xbf16>, vector<8x8xbf16>, vector<8x8xf32> -> vector<8x8xf32>
      %c0_27 = arith.constant 0 : index
      %c1 = arith.constant 1 : index
      %c0_28 = arith.constant 0 : index
      %c0_29 = arith.constant 0 : index
      %42 = vector.load %arg2[%c0_27, %c1, %c0_28, %c0_29] : memref<1x2x8x8xbf16, #tpu.memory_space<vmem>>, vector<1x1x8x8xbf16>
      %43 = vector.shape_cast %42 : vector<1x1x8x8xbf16> to vector<8x8xbf16>
      %44 = arith.extf %43 : vector<8x8xbf16> to vector<8x8xf32>
      %45 = arith.addf %41, %44 : vector<8x8xf32>
      %cst_30 = arith.constant dense<0xFF800000> : vector<8xf32>
      %46 = vector.multi_reduction <maximumf>, %45, %cst_30 [1] : vector<8x8xf32> to vector<8xf32>
      %47 = vector.shape_cast %46 : vector<8xf32> to vector<8x1xf32>
      %48 = vector.broadcast %47 : vector<8x1xf32> to vector<8x8xf32>
      %49 = arith.subf %45, %48 : vector<8x8xf32>
      %50 = math.exp %49 : vector<8x8xf32>
      %cst_31 = arith.constant dense<0.000000e+00> : vector<8xf32>
      %51 = vector.multi_reduction <add>, %50, %cst_31 [1] : vector<8x8xf32> to vector<8xf32>
      %52 = vector.shape_cast %51 : vector<8xf32> to vector<8x1xf32>
      %53 = arith.truncf %50 : vector<8x8xf32> to vector<8x8xbf16>
      %cst_32 = arith.constant dense<0.000000e+00> : vector<8x8xf32>
      %54 = tpu.matmul %53, %40, %cst_32 {dimension_numbers = #tpu.dot_dimension_numbers<[1], [0], [0], [1], [0, 0, 1, 1], [], []>} : vector<8x8xbf16>, vector<8x8xbf16>, vector<8x8xf32> -> vector<8x8xf32>
      %55 = tpu.reciprocal %52 {approx = true} : vector<8x1xf32> -> vector<8x1xf32>
      %56 = vector.broadcast %55 : vector<8x1xf32> to vector<8x8xf32>
      %57 = arith.mulf %54, %56 : vector<8x8xf32>
      %58 = tpu.concatenate %37, %57 in 1 : vector<8x8xf32>, vector<8x8xf32> -> vector<8x16xf32>
      %c0_33 = arith.constant 0 : index
      %c0_34 = arith.constant 0 : index
      %59 = vector.load %arg12[%c0_33, %c0_34] : memref<16x16xf32, #tpu.memory_space<vmem>>, vector<8x16xf32>
      tpu.vector_store %arg12[%c0_33, %c0_34], %58 {strides = array<i32>} : memref<16x16xf32, #tpu.memory_space<vmem>>, vector<8x16xf32>,
      %c8_35 = arith.constant 8 : index
      %c0_36 = arith.constant 0 : index
      %60 = vector.load %arg11[%c8_35, %c0_36] : memref<16x48xbf16, #tpu.memory_space<vmem>>, vector<8x8xbf16>
      %c8_37 = arith.constant 8 : index
      %c16_38 = arith.constant 16 : index
      %61 = vector.load %arg11[%c8_37, %c16_38] : memref<16x48xbf16, #tpu.memory_space<vmem>>, vector<8x8xbf16>
      %c8_39 = arith.constant 8 : index
      %c32_40 = arith.constant 32 : index
      %62 = vector.load %arg11[%c8_39, %c32_40] : memref<16x48xbf16, #tpu.memory_space<vmem>>, vector<8x8xbf16>
      %cst_41 = arith.constant dense<0.000000e+00> : vector<8x8xf32>
      %63 = tpu.matmul %60, %61, %cst_41 {dimension_numbers = #tpu.dot_dimension_numbers<[1], [1], [0], [0], [0, 0, 1, 0], [], []>} : vector<8x8xbf16>, vector<8x8xbf16>, vector<8x8xf32> -> vector<8x8xf32>
      %c0_42 = arith.constant 0 : index
      %c0_43 = arith.constant 0 : index
      %c0_44 = arith.constant 0 : index
      %c0_45 = arith.constant 0 : index
      %64 = vector.load %arg2[%c0_42, %c0_43, %c0_44, %c0_45] : memref<1x2x8x8xbf16, #tpu.memory_space<vmem>>, vector<1x1x8x8xbf16>
      %65 = vector.shape_cast %64 : vector<1x1x8x8xbf16> to vector<8x8xbf16>
      %66 = arith.extf %65 : vector<8x8xbf16> to vector<8x8xf32>
      %67 = arith.addf %63, %66 : vector<8x8xf32>
      %cst_46 = arith.constant dense<0xFF800000> : vector<8xf32>
      %68 = vector.multi_reduction <maximumf>, %67, %cst_46 [1] : vector<8x8xf32> to vector<8xf32>
      %69 = vector.shape_cast %68 : vector<8xf32> to vector<8x1xf32>
      %70 = vector.broadcast %69 : vector<8x1xf32> to vector<8x8xf32>
      %71 = arith.subf %67, %70 : vector<8x8xf32>
      %72 = math.exp %71 : vector<8x8xf32>
      %cst_47 = arith.constant dense<0.000000e+00> : vector<8xf32>
      %73 = vector.multi_reduction <add>, %72, %cst_47 [1] : vector<8x8xf32> to vector<8xf32>
      %74 = vector.shape_cast %73 : vector<8xf32> to vector<8x1xf32>
      %75 = arith.truncf %72 : vector<8x8xf32> to vector<8x8xbf16>
      %cst_48 = arith.constant dense<0.000000e+00> : vector<8x8xf32>
      %76 = tpu.matmul %75, %62, %cst_48 {dimension_numbers = #tpu.dot_dimension_numbers<[1], [0], [0], [1], [0, 0, 1, 1], [], []>} : vector<8x8xbf16>, vector<8x8xbf16>, vector<8x8xf32> -> vector<8x8xf32>
      %77 = tpu.reciprocal %74 {approx = true} : vector<8x1xf32> -> vector<8x1xf32>
      %78 = vector.broadcast %77 : vector<8x1xf32> to vector<8x8xf32>
      %79 = arith.mulf %76, %78 : vector<8x8xf32>
      %c8_49 = arith.constant 8 : index
      %c8_50 = arith.constant 8 : index
      %80 = vector.load %arg11[%c8_49, %c8_50] : memref<16x48xbf16, #tpu.memory_space<vmem>>, vector<8x8xbf16>
      %c8_51 = arith.constant 8 : index
      %c24_52 = arith.constant 24 : index
      %81 = vector.load %arg11[%c8_51, %c24_52] : memref<16x48xbf16, #tpu.memory_space<vmem>>, vector<8x8xbf16>
      %c8_53 = arith.constant 8 : index
      %c40_54 = arith.constant 40 : index
      %82 = vector.load %arg11[%c8_53, %c40_54] : memref<16x48xbf16, #tpu.memory_space<vmem>>, vector<8x8xbf16>
      %cst_55 = arith.constant dense<0.000000e+00> : vector<8x8xf32>
      %83 = tpu.matmul %80, %81, %cst_55 {dimension_numbers = #tpu.dot_dimension_numbers<[1], [1], [0], [0], [0, 0, 1, 0], [], []>} : vector<8x8xbf16>, vector<8x8xbf16>, vector<8x8xf32> -> vector<8x8xf32>
      %c0_56 = arith.constant 0 : index
      %c1_57 = arith.constant 1 : index
      %c0_58 = arith.constant 0 : index
      %c0_59 = arith.constant 0 : index
      %84 = vector.load %arg2[%c0_56, %c1_57, %c0_58, %c0_59] : memref<1x2x8x8xbf16, #tpu.memory_space<vmem>>, vector<1x1x8x8xbf16>
      %85 = vector.shape_cast %84 : vector<1x1x8x8xbf16> to vector<8x8xbf16>
      %86 = arith.extf %85 : vector<8x8xbf16> to vector<8x8xf32>
      %87 = arith.addf %83, %86 : vector<8x8xf32>
      %cst_60 = arith.constant dense<0xFF800000> : vector<8xf32>
      %88 = vector.multi_reduction <maximumf>, %87, %cst_60 [1] : vector<8x8xf32> to vector<8xf32>
      %89 = vector.shape_cast %88 : vector<8xf32> to vector<8x1xf32>
      %90 = vector.broadcast %89 : vector<8x1xf32> to vector<8x8xf32>
      %91 = arith.subf %87, %90 : vector<8x8xf32>
      %92 = math.exp %91 : vector<8x8xf32>
      %cst_61 = arith.constant dense<0.000000e+00> : vector<8xf32>
      %93 = vector.multi_reduction <add>, %92, %cst_61 [1] : vector<8x8xf32> to vector<8xf32>
      %94 = vector.shape_cast %93 : vector<8xf32> to vector<8x1xf32>
      %95 = arith.truncf %92 : vector<8x8xf32> to vector<8x8xbf16>
      %cst_62 = arith.constant dense<0.000000e+00> : vector<8x8xf32>
      %96 = tpu.matmul %95, %82, %cst_62 {dimension_numbers = #tpu.dot_dimension_numbers<[1], [0], [0], [1], [0, 0, 1, 1], [], []>} : vector<8x8xbf16>, vector<8x8xbf16>, vector<8x8xf32> -> vector<8x8xf32>
      %97 = tpu.reciprocal %94 {approx = true} : vector<8x1xf32> -> vector<8x1xf32>
      %98 = vector.broadcast %97 : vector<8x1xf32> to vector<8x8xf32>
      %99 = arith.mulf %96, %98 : vector<8x8xf32>
      %100 = tpu.concatenate %79, %99 in 1 : vector<8x8xf32>, vector<8x8xf32> -> vector<8x16xf32>
      %c8_63 = arith.constant 8 : index
      %c0_64 = arith.constant 0 : index
      %101 = vector.load %arg12[%c8_63, %c0_64] : memref<16x16xf32, #tpu.memory_space<vmem>>, vector<8x16xf32>
      tpu.vector_store %arg12[%c8_63, %c0_64], %100 {strides = array<i32>} : memref<16x16xf32, #tpu.memory_space<vmem>>, vector<8x16xf32>,
      %c0_65 = arith.constant 0 : index
      %c0_66 = arith.constant 0 : index
      %102 = vector.load %arg13[%c0_65, %c0_66] : memref<16x32xf32, #tpu.memory_space<vmem>>, vector<16x32xf32>
      %c0_67 = arith.constant 0 : index
      %c0_68 = arith.constant 0 : index
      %103 = vector.load %arg12[%c0_67, %c0_68] : memref<16x16xf32, #tpu.memory_space<vmem>>, vector<16x16xf32>
      %104 = arith.truncf %103 : vector<16x16xf32> to vector<16x16xbf16>
      %c0_69 = arith.constant 0 : index
      %c0_70 = arith.constant 0 : index
      %c0_71 = arith.constant 0 : index
      %105 = vector.load %arg5[%c0_69, %c0_70, %c0_71] : memref<1x16x32xbf16, #tpu.memory_space<vmem>>, vector<1x16x32xbf16>
      %106 = vector.shape_cast %105 : vector<1x16x32xbf16> to vector<16x32xbf16>
      %cst_72 = arith.constant dense<0.000000e+00> : vector<16x32xf32>
      %107 = tpu.matmul %104, %106, %cst_72 {dimension_numbers = #tpu.dot_dimension_numbers<[1], [0], [0], [1], [0, 0, 1, 1], [], []>} : vector<16x16xbf16>, vector<16x32xbf16>, vector<16x32xf32> -> vector<16x32xf32>
      %108 = arith.addf %102, %107 : vector<16x32xf32>
      %c0_73 = arith.constant 0 : index
      %c0_74 = arith.constant 0 : index
      %109 = vector.load %arg13[%c0_73, %c0_74] : memref<16x32xf32, #tpu.memory_space<vmem>>, vector<16x32xf32>
      tpu.vector_store %arg13[%c0_73, %c0_74], %108 {strides = array<i32>} : memref<16x32xf32, #tpu.memory_space<vmem>>, vector<16x32xf32>,
    } else {
    }
    %c1_i32 = arith.constant 1 : i32
    %6 = arith.cmpi eq, %arg0, %c1_i32 : i32
    %7 = arith.extui %6 : i1 to i32
    %c0_i32_2 = arith.constant 0 : i32
    %8 = arith.cmpi ne, %7, %c0_i32_2 : i32
    scf.if %8 {
      %c0 = arith.constant 0 : index
      %c0_5 = arith.constant 0 : index
      %12 = vector.load %arg13[%c0, %c0_5] : memref<16x32xf32, #tpu.memory_space<vmem>>, vector<16x32xf32>
      %c0_6 = arith.constant 0 : index
      %c0_7 = arith.constant 0 : index
      %13 = vector.load %arg6[%c0_6, %c0_7] : memref<1x32xf32, #tpu.memory_space<vmem>>, vector<1x32xf32>
      %14 = arith.mulf %12, %12 : vector<16x32xf32>
      %cst = arith.constant dense<0.000000e+00> : vector<16xf32>
      %15 = vector.multi_reduction <add>, %14, %cst [1] : vector<16x32xf32> to vector<16xf32>
      %16 = vector.shape_cast %15 : vector<16xf32> to vector<16x1xf32>
      %cst_8 = arith.constant 3.200000e+01 : f32
      %17 = vector.broadcast %cst_8 : f32 to vector<16x1xf32>
      %18 = arith.divf %16, %17 : vector<16x1xf32>
      %cst_9 = arith.constant 9.99999997E-7 : f32
      %19 = vector.broadcast %cst_9 : f32 to vector<16x1xf32>
      %20 = arith.addf %18, %19 : vector<16x1xf32>
      %21 = math.rsqrt %20 : vector<16x1xf32>
      %22 = vector.broadcast %21 : vector<16x1xf32> to vector<16x32xf32>
      %23 = arith.mulf %12, %22 : vector<16x32xf32>
      %24 = vector.broadcast %13 : vector<1x32xf32> to vector<16x32xf32>
      %25 = arith.mulf %23, %24 : vector<16x32xf32>
      %26 = arith.truncf %25 : vector<16x32xf32> to vector<16x32xbf16>
      %c0_10 = arith.constant 0 : index
      %c0_11 = arith.constant 0 : index
      %27 = vector.load %arg14[%c0_10, %c0_11] : memref<16x32xbf16, #tpu.memory_space<vmem>>, vector<16x32xbf16>
      tpu.vector_store %arg14[%c0_10, %c0_11], %26 {strides = array<i32>} : memref<16x32xbf16, #tpu.memory_space<vmem>>, vector<16x32xbf16>,
    } else {
    }
    %c2_i32_3 = arith.constant 2 : i32
    %9 = arith.cmpi sge, %arg0, %c2_i32_3 : i32
    %10 = arith.extui %9 : i1 to i32
    %c0_i32_4 = arith.constant 0 : i32
    %11 = arith.cmpi ne, %10, %c0_i32_4 : i32
    scf.if %11 {
      %c0 = arith.constant 0 : index
      %c0_5 = arith.constant 0 : index
      %12 = vector.load %arg14[%c0, %c0_5] : memref<16x32xbf16, #tpu.memory_space<vmem>>, vector<16x32xbf16>
      %c0_6 = arith.constant 0 : index
      %c0_7 = arith.constant 0 : index
      %c0_8 = arith.constant 0 : index
      %13 = vector.load %arg7[%c0_6, %c0_7, %c0_8] : memref<1x32x128xbf16, #tpu.memory_space<vmem>>, vector<1x32x128xbf16>
      %14 = vector.shape_cast %13 : vector<1x32x128xbf16> to vector<32x128xbf16>
      %cst = arith.constant dense<0.000000e+00> : vector<16x128xf32>
      %15 = tpu.matmul %12, %14, %cst {dimension_numbers = #tpu.dot_dimension_numbers<[1], [0], [0], [1], [0, 0, 1, 1], [], []>} : vector<16x32xbf16>, vector<32x128xbf16>, vector<16x128xf32> -> vector<16x128xf32>
      %16 = vector.extract_strided_slice %15 {offsets = [0, 0], sizes = [16, 64], strides = [1, 1]} : vector<16x128xf32> to vector<16x64xf32>
      %cst_9 = arith.constant 5.000000e-01 : f32
      %17 = vector.broadcast %cst_9 : f32 to vector<16x64xf32>
      %18 = arith.mulf %17, %16 : vector<16x64xf32>
      %cst_10 = arith.constant 4.471500e-02 : f32
      %19 = vector.broadcast %cst_10 : f32 to vector<16x64xf32>
      %20 = arith.mulf %19, %16 : vector<16x64xf32>
      %21 = arith.mulf %20, %16 : vector<16x64xf32>
      %22 = arith.mulf %21, %16 : vector<16x64xf32>
      %23 = arith.addf %16, %22 : vector<16x64xf32>
      %cst_11 = arith.constant 0.797884583 : f32
      %24 = vector.broadcast %cst_11 : f32 to vector<16x64xf32>
      %25 = arith.mulf %24, %23 : vector<16x64xf32>
      %26 = math.tanh %25 : vector<16x64xf32>
      %cst_12 = arith.constant 1.000000e+00 : f32
      %27 = vector.broadcast %cst_12 : f32 to vector<16x64xf32>
      %28 = arith.addf %27, %26 : vector<16x64xf32>
      %29 = arith.mulf %18, %28 : vector<16x64xf32>
      %30 = vector.extract_strided_slice %15 {offsets = [0, 64], sizes = [16, 64], strides = [1, 1]} : vector<16x128xf32> to vector<16x64xf32>
      %31 = arith.mulf %29, %30 : vector<16x64xf32>
      %32 = arith.truncf %31 : vector<16x64xf32> to vector<16x64xbf16>
      %c0_13 = arith.constant 0 : index
      %c0_14 = arith.constant 0 : index
      %c0_15 = arith.constant 0 : index
      %33 = vector.load %arg8[%c0_13, %c0_14, %c0_15] : memref<1x64x32xbf16, #tpu.memory_space<vmem>>, vector<1x64x32xbf16>
      %34 = vector.shape_cast %33 : vector<1x64x32xbf16> to vector<64x32xbf16>
      %cst_16 = arith.constant dense<0.000000e+00> : vector<16x32xf32>
      %35 = tpu.matmul %32, %34, %cst_16 {dimension_numbers = #tpu.dot_dimension_numbers<[1], [0], [0], [1], [0, 0, 1, 1], [], []>} : vector<16x64xbf16>, vector<64x32xbf16>, vector<16x32xf32> -> vector<16x32xf32>
      %c0_17 = arith.constant 0 : index
      %c0_18 = arith.constant 0 : index
      %36 = vector.load %arg13[%c0_17, %c0_18] : memref<16x32xf32, #tpu.memory_space<vmem>>, vector<16x32xf32>
      %37 = arith.addf %36, %35 : vector<16x32xf32>
      %38 = vector.shape_cast %37 : vector<16x32xf32> to vector<2x8x32xf32>
      %c0_19 = arith.constant 0 : index
      %c0_20 = arith.constant 0 : index
      %c0_21 = arith.constant 0 : index
      %39 = vector.load %arg9[%c0_19, %c0_20, %c0_21] : memref<2x8x32xf32, #tpu.memory_space<vmem>>, vector<2x8x32xf32>
      tpu.vector_store %arg9[%c0_19, %c0_20, %c0_21], %38 {strides = array<i32>} : memref<2x8x32xf32, #tpu.memory_space<vmem>>, vector<2x8x32xf32>,
    } else {
    }
    return
  }
  func.func @transform_0(%arg0: i32) -> (i32, i32, i32) {
    %c0_i32 = arith.constant 0 : i32
    %c0_i32_0 = arith.constant 0 : i32
    %c0_i32_1 = arith.constant 0 : i32
    %c0_i32_2 = arith.constant 0 : i32
    return %c0_i32, %c0_i32_0, %c0_i32_1 : i32, i32, i32
  }
  func.func @transform_1(%arg0: i32) -> (i32, i32, i32, i32) {
    %c1_i32 = arith.constant 1 : i32
    %0 = arith.minsi %arg0, %c1_i32 : i32
    %c0_i32 = arith.constant 0 : i32
    %c0_i32_0 = arith.constant 0 : i32
    %c0_i32_1 = arith.constant 0 : i32
    %c0_i32_2 = arith.constant 0 : i32
    return %c0_i32, %0, %c0_i32_0, %c0_i32_1 : i32, i32, i32, i32
  }
  func.func @transform_2(%arg0: i32) -> (i32, i32) {
    %c0_i32 = arith.constant 0 : i32
    %c0_i32_0 = arith.constant 0 : i32
    %c0_i32_1 = arith.constant 0 : i32
    return %c0_i32, %c0_i32_0 : i32, i32
  }
  func.func @transform_3(%arg0: i32) -> (i32, i32, i32) {
    %c1_i32 = arith.constant 1 : i32
    %0 = arith.minsi %arg0, %c1_i32 : i32
    %c0_i32 = arith.constant 0 : i32
    %c0_i32_0 = arith.constant 0 : i32
    %c0_i32_1 = arith.constant 0 : i32
    return %0, %c0_i32, %c0_i32_0 : i32, i32, i32
  }
  func.func @transform_4(%arg0: i32) -> (i32, i32, i32) {
    %c1_i32 = arith.constant 1 : i32
    %0 = arith.minsi %arg0, %c1_i32 : i32
    %c0_i32 = arith.constant 0 : i32
    %c0_i32_0 = arith.constant 0 : i32
    %c0_i32_1 = arith.constant 0 : i32
    return %0, %c0_i32, %c0_i32_0 : i32, i32, i32
  }
  func.func @transform_5(%arg0: i32) -> (i32, i32) {
    %c0_i32 = arith.constant 0 : i32
    %c0_i32_0 = arith.constant 0 : i32
    %c0_i32_1 = arith.constant 0 : i32
    return %c0_i32, %c0_i32_0 : i32, i32
  }
  func.func @transform_6(%arg0: i32) -> (i32, i32, i32) {
    %c2_i32 = arith.constant 2 : i32
    %0 = arith.subi %arg0, %c2_i32 : i32
    %c0_i32 = arith.constant 0 : i32
    %1 = arith.maxsi %0, %c0_i32 : i32
    %c0_i32_0 = arith.constant 0 : i32
    %c0_i32_1 = arith.constant 0 : i32
    %c0_i32_2 = arith.constant 0 : i32
    return %1, %c0_i32_0, %c0_i32_1 : i32, i32, i32
  }
  func.func @transform_7(%arg0: i32) -> (i32, i32, i32) {
    %c2_i32 = arith.constant 2 : i32
    %0 = arith.subi %arg0, %c2_i32 : i32
    %c0_i32 = arith.constant 0 : i32
    %1 = arith.maxsi %0, %c0_i32 : i32
    %c0_i32_0 = arith.constant 0 : i32
    %c0_i32_1 = arith.constant 0 : i32
    %c0_i32_2 = arith.constant 0 : i32
    return %1, %c0_i32_0, %c0_i32_1 : i32, i32, i32
  }
  func.func @transform_8(%arg0: i32) -> (i32, i32, i32) {
    %c0_i32 = arith.constant 0 : i32
    %c0_i32_0 = arith.constant 0 : i32
    %c0_i32_1 = arith.constant 0 : i32
    %c0_i32_2 = arith.constant 0 : i32
    return %c0_i32, %c0_i32_0, %c0_i32_1 : i32, i32, i32
  }
}

</mosaic_0001>

<bundles_post_ra>
// kernel: tpu_custom_call.1
= control target key start
LH: loop header
LB: loop body
LE: loop exit
PB: predicated region body
PF: predicated region fallthrough
CT: control target
= control target key end

     0   :  { %s2486_s0 = inlined_call_operand.vmem [shape: f32[2,8,32], index: 0, kind: input, shape index: {}]   ;;  %s2487_s1 = inlined_call_operand.hbm [shape: bf16[1,4,8,8], index: 1, kind: input, shape index: {}]   ;;  %s2488_s2 = inlined_call_operand.vmem [shape: f32[1,32], index: 2, kind: input, shape index: {}]   ;;  %s2489_s3 = inlined_call_operand.vmem [shape: bf16[2,32,48], index: 3, kind: input, shape index: {}]   ;;  %s2490_s4 = inlined_call_operand.hbm [shape: bf16[2,16,32], index: 4, kind: input, shape index: {}]   ;;  %s2491_s5 = inlined_call_operand.vmem [shape: f32[1,32], index: 5, kind: input, shape index: {}]   ;;  %s2492_s6 = inlined_call_operand.hbm [shape: bf16[1,32,128], index: 6, kind: input, shape index: {}]   ;;  %s2493_s7 = inlined_call_operand.vmem [shape: bf16[1,64,32], index: 7, kind: input, shape index: {}]   ;;  %s2494_s8 = inlined_call_operand.hbm [shape: f32[2,8,32], index: 8, kind: output, shape index: {}]  }
   0x1   :  { %2506 = sst [smem:[#allocation19_spill]] %s2487_s1 }
   0x2   :  { %2507 = sst [smem:[#allocation20_spill]] %s2490_s4 }
   0x3   :  { %2508 = sst [smem:[#allocation21_spill]] %s2494_s8 }
   0x4   :  { %13 = vsyncpa [#allocation8], 0 }
   0x5   :  { %15 = vsyncpa [#allocation8 + $0x1], 0 }
   0x6   :  { %16 = vsyncpa [#allocation11], 0 }
   0x7   :  { %18 = vsyncpa [#allocation11 + $0x1], 0 }
   0x8   :  { %19 = vsyncpa [#allocation9], 0  ;;  %s2084_s27 = smov 0   ;;  %s2086_s28 = smov 0  }
   0x9   :  { %s2088_s29 = smov 0   ;;  %s2090_s30 = smov 0  }
   0xa   :  { %s2092_s9 = smov 0   ;;  %s2094_s10 = smov 0  }
   0xb   :  { %s2096_s11 = smov 0  }
   0xc LB: > { %s2118_s12 = sadd.s32 4294967295, %s2018_s11   ;;  %s2121_s13 = sadd.s32 1, %s2018_s11   ;;  %s2018_s11 = sphi %s2096_s11, %s2537_s11   ;;  %s2014_s10 = sphi %s2094_s10, %s2536_s10   ;;  %s2010_s9 = sphi %s2092_s9, %s2535_s9   ;;  %s2006_s30 = sphi %s2090_s30, %s2534_s30   ;;  %s2002_s29 = sphi %s2088_s29, %s2533_s29   ;;  %s1998_s28 = sphi %s2086_s28, %s2532_s28   ;;  %s1994_s27 = sphi %s2084_s27, %s2531_s27  }
   0xd   : > { %p50_p0 = scmp.lt.s32.totalorder %s2018_s11, 1  ;;  %p52_p1 = scmp.lt.s32.totalorder %s2121_s13, 1 }
   0xe   : > { %s57_s14 = sadd.s32 1, %s2014_s10  ;;  %p64_p2 = scmp.ne.s32.totalorder %s2014_s10, %s2010_s9 }
   0xf   : > { %s2129_s15 = scalar_select %p50_p0, %s2018_s11, 1 }
  0x10   : > { %s53_s16 = scalar_select %p52_p1, %s2121_s13, 1 }
  0x11   : > { %p2499_p3 = scmp.eq.s32.totalorder %s2018_s11, 0  ;;  %p70_p4 = scmp.ne.s32.totalorder %s2010_s9, %s2006_s30 }
  0x12   : > { %s54_s17 = ssub.s32 %s2129_s15, %s53_s16  ;;  %p2498_p5 = scmp.eq.s32.totalorder %s2118_s12, 0 }
  0x13   : > { %p55_p6 = scmp.eq.s32.totalorder %s54_s17, 0  ;;  %p66_p7 = por %p2499_p3, %p64_p2 }
  0x14   : > { %p2140_p8 = por %p2498_p5, %p70_p4  ;;  %p2497_p9 = scmp.lt.s32.totalorder %s2018_s11, 3 }
  0x15   : > { %s2145_s19 = scalar_select %p55_p6, %s2014_s10, %s57_s14  }
  0x16   : > { %s2509_s18 = scalar_select %p2140_p8, 1, 0 }
  0x17   : > { %2510 = sst [smem:[#allocation18_spill]] %s2145_s19  ;;  %s2495_s20 = sand.u32 1, %s2014_s10  }
  0x18   : > { %s2151_s21 = sshll.u32 %s2495_s20, 3  ;;  %s2496_s22 = sshll.u32 %s2129_s15, 7 }
  0x19   : > { %p2156_p10 = pnand %p2497_p9, %p66_p7  ;;  %s325_s24 = sand.u32 1, %s2018_s11  }
  0x1a   : > { %s2512_s4 = sld [smem:[#allocation20_spill]]  ;;  %s329_s14 = scalar_lea.vmem [#allocation10], %s2151_s21 }
  0x1b   : > { %s338_s16 = sshll.u32 %s329_s14, 4  ;;  %s2173_s17 = scalar_lea.sflag [#allocation11], %s325_s24  ;;  %s2170_s16 = int_to_ptr.vmem [resolvable:$true] %s338_s16 }
  0x1c   : > { %p1842_p0 = pneg %p2156_p10 }
  0x20   : > { %s2166_s30 = scalar_lea.hbm %s2512_s4, %s2496_s22  ;;  %s1845_s22 = scalar_lea.hbm %s2512_s4, 256 }
  0x21   : > { %s1840_s20 = scalar_lea.hbm %s2166_s30, 128  ;;  %p1846_p4 = scmp.lt.s32.totalorder %s2166_s30, %s2512_s4 }
  0x22   : > { %p1841_p13 = scmp.ne.s32.totalorder %s2166_s30, %s1840_s20  ;;  %p1847_p6 = scmp.lt.s32.totalorder %s1845_s22, %s1840_s20 }
  0x24   : > { %p1843_p1 = pnand %p1842_p0, %p1841_p13  ;;  %p1848_p7 = por %p1847_p6, %p1846_p4 }
  0x26   : > { %p1844_p2 = pneg %p1843_p1 }
  0x28   : > { %p1849_p9 = pnand %p1848_p7, %p1844_p2 }
  0x2a   : > { %1852 = shalt.err (!%p1849_p9)
}
  0x2b   : > { %s1853_s24 = scalar_lea.vmem %s2170_s16, 128  ;;  %s2020_s25 = smov [#allocation10]  }
  0x2c   : > { %p1854_p5 = scmp.ne.s32.totalorder %s2170_s16, %s1853_s24  ;;  %s1858_s26 = sshll.u32 %s2020_s25, 4  ;;  %s1859_s26 = int_to_ptr.vmem [resolvable:$false] %s1858_s26 }
  0x2d   : > { %s1860_s8 = scalar_lea.vmem %s1859_s26, 256  ;;  %p1861_p3 = scmp.lt.s32.totalorder %s2170_s16, %s1859_s26 }
  0x2e   : > { %p1856_p13 = pnand %p1854_p5, %p1842_p0  ;;  %p1862_p11 = scmp.lt.s32.totalorder %s1860_s8, %s1853_s24 }
  0x30   : > { %p1857_p1 = pneg %p1856_p13  ;;  %p1863_p12 = por %p1862_p11, %p1861_p3 }
  0x32   : > { %p1864_p4 = pnand %p1863_p12, %p1857_p1 }
  0x34   : > { %1867 = shalt.err (!%p1864_p4)
}
  0x35   : > { %s2500_s19 = smov 64   ;;  %s2502_s20 = smov 4  }
  0x36   : > { %1720 = dma.hbm_to_vmem [thread:$0]  (!%p2156_p10), %s2166_s30, 128, %s2170_s16, %s2173_s17, %s2500_s19, %s2500_s19, %s2502_s20  }
  0x37   : > { %p2513_p3 = scmp.lt.s32.totalorder %s2018_s11, 4  ;;  %p2514_p5 = scmp.ge.s32.totalorder %s2018_s11, 1 }
  0x38   : > { %s2516_s22 = sshll.u32 %s2129_s15, 7  ;;  %s2517_s1 = sld [smem:[#allocation19_spill]] }
  0x39   : > { %p2207_p9 = pnand %p2514_p5, %p2513_p3  ;;  %s294_s26 = scalar_lea.vmem [#allocation7], %s2151_s21 }
  0x3a   : > { %s303_s4 = sshll.u32 %s294_s26, 4  ;;  %s2518_s30 = sand.u32 1, %s2014_s10   ;;  %s2219_s4 = int_to_ptr.vmem [resolvable:$true] %s303_s4 }
  0x3b   : > { %s2515_s8 = scalar_select %p2207_p9, 1, 0 }
  0x3c   : > { %s291_s16 = scalar_lea.sflag [#allocation8], %s2518_s30 }
  0x3e   : > { %s2216_s25 = scalar_lea.hbm %s2517_s1, %s2516_s22  ;;  %s1873_s22 = scalar_lea.hbm %s2517_s1, 256 }
  0x3f   : > { %s1868_s19 = scalar_lea.hbm %s2216_s25, 128  ;;  %p1874_p6 = scmp.lt.s32.totalorder %s2216_s25, %s2517_s1 }
  0x40   : > { %p1869_p11 = scmp.ne.s32.totalorder %s2216_s25, %s1868_s19  ;;  %p1875_p7 = scmp.lt.s32.totalorder %s1873_s22, %s1868_s19 }
  0x42   : > { %p1871_p12 = pnand %p1869_p11, %p1842_p0  ;;  %p1876_p13 = por %p1875_p7, %p1874_p6 }
  0x44   : > { %p1872_p2 = pneg %p1871_p12 }
  0x46   : > { %p1877_p1 = pnand %p1876_p13, %p1872_p2 }
  0x48   : > { %1880 = shalt.err (!%p1877_p1)
}
  0x49   : > { %s1881_s21 = scalar_lea.vmem %s2219_s4, 128  ;;  %s2023_s20 = smov [#allocation7]  }
  0x4a   : > { %p1882_p4 = scmp.ne.s32.totalorder %s2219_s4, %s1881_s21  ;;  %s1886_s26 = sshll.u32 %s2023_s20, 4  ;;  %s1887_s26 = int_to_ptr.vmem [resolvable:$false] %s1886_s26 }
  0x4b   : > { %s1888_s30 = scalar_lea.vmem %s1887_s26, 256  ;;  %p1889_p11 = scmp.lt.s32.totalorder %s2219_s4, %s1887_s26 }
  0x4c   : > { %p1884_p3 = pnand %p1882_p4, %p1842_p0  ;;  %p1890_p12 = scmp.lt.s32.totalorder %s1888_s30, %s1881_s21 }
  0x4e   : > { %p1885_p5 = pneg %p1884_p3  ;;  %p1891_p8 = por %p1890_p12, %p1889_p11 }
  0x50   : > { %p1892_p6 = pnand %p1891_p8, %p1885_p5 }
  0x52   : > { %1895 = shalt.err (!%p1892_p6)
}
  0x53   : > { %s2519_s19 = smov 4   ;;  %s2520_s15 = smov 64  }
  0x54   : > { %1717 = dma.hbm_to_vmem [thread:$0]  (!%p2156_p10), %s2216_s25, 128, %s2219_s4, %s291_s16, %s2520_s15, %s2520_s15, %s2519_s19  }
  0x55   : > { %s1507_s22 = sadd.s32 4294967294, %s2018_s11  ;;  %s1508_s14 = sadd.s32 4294967294, %s2121_s13 }
  0x56   : > { %p183_p8 = scmp.gt.s32.totalorder %s1507_s22, 0  ;;  %p186_p0 = scmp.gt.s32.totalorder %s1508_s14, 0 }
  0x57   : > { %s191_s23 = sadd.s32 1, %s2002_s29  ;;  %p198_p2 = scmp.ne.s32.totalorder %s2002_s29, %s1998_s28 }
  0x58   : > { %s2539_s22 = smov (!%p183_p8, %s1507_s22), 0  ;;  %s2541_s14 = smov (!%p186_p0, %s1508_s14), 0 }
  0x59   : > { %p2521_p7 = scmp.eq.s32.totalorder %s2018_s11, 0  ;;  %p204_p1 = scmp.ne.s32.totalorder %s1998_s28, %s1994_s27 }
  0x5a   : > { %s188_s24 = ssub.s32 %s2539_s22, %s2541_s14  ;;  %s350_s21 = sand.u32 1, %s2002_s29  }
  0x5b   : > { %p200_p13 = por %p198_p2, %p2521_p7  ;;  %p189_p4 = scmp.eq.s32.totalorder %s188_s24, 0 }
  0x5c   : > { %p2522_p3 = scmp.eq.s32.totalorder %s2118_s12, 0  ;;  %s1519_s4 = sshll.u32 %s350_s21, 4 }
  0x5d   : > { %s1585_s25 = sshll.u32 %s2539_s22, 8  ;;  %s352_s27 = scalar_lea.vmem [#allocation12], %s1519_s4 }
  0x5e   : > { %p2260_p5 = por %p204_p1, %p2522_p3  ;;  %s2270_s1 = scalar_lea.hbm %s2492_s6, %s1585_s25 }
  0x5f   : > { %s2265_s16 = scalar_select %p189_p4, %s2002_s29, %s191_s23  }
  0x60   : > { %s2523_s20 = scalar_select %p2260_p5, 1, 0 }
  0x61   : > { %s362_s14 = sshll.u32 %s352_s27, 4  ;;  %p2524_p10 = scmp.lt.s32.totalorder %s2018_s11, 3  ;;  %s2278_s14 = int_to_ptr.vmem [resolvable:$true] %s362_s14 }
  0x62   : > { %s1896_s22 = scalar_lea.hbm %s2270_s1, 256  ;;  %s1901_s25 = scalar_lea.hbm %s2492_s6, 256 }
  0x63   : > { %p2274_p11 = pnand %p2524_p10, %p200_p13  ;;  %p1897_p12 = scmp.ne.s32.totalorder %s2270_s1, %s1896_s22 }
  0x64   : > { %p1902_p2 = scmp.lt.s32.totalorder %s2270_s1, %s2492_s6  ;;  %p1903_p7 = scmp.lt.s32.totalorder %s1901_s25, %s1896_s22 }
  0x65   : > { %p1898_p6 = pneg %p2274_p11 }
  0x66   : > { %p1904_p13 = por %p1903_p7, %p1902_p2 }
  0x67   : > { %p1899_p8 = pnand %p1898_p6, %p1897_p12 }
  0x69   : > { %p1900_p0 = pneg %p1899_p8 }
  0x6b   : > { %p1905_p1 = pnand %p1904_p13, %p1900_p0 }
  0x6d   : > { %1908 = shalt.err (!%p1905_p1)
}
  0x6e   : > { %s1909_s11 = scalar_lea.vmem %s2278_s14, 256  ;;  %s2024_s30 = smov [#allocation12]  }
  0x6f   : > { %p1910_p4 = scmp.ne.s32.totalorder %s2278_s14, %s1909_s11  ;;  %s1914_s27 = sshll.u32 %s2024_s30, 4  ;;  %s1915_s27 = int_to_ptr.vmem [resolvable:$false] %s1914_s27 }
  0x70   : > { %s1916_s23 = scalar_lea.vmem %s1915_s27, 512  ;;  %p1917_p12 = scmp.lt.s32.totalorder %s2278_s14, %s1915_s27 }
  0x71   : > { %p1912_p3 = pnand %p1910_p4, %p1898_p6  ;;  %p1918_p8 = scmp.lt.s32.totalorder %s1916_s23, %s1909_s11 }
  0x73   : > { %p1913_p10 = pneg %p1912_p3  ;;  %p1919_p5 = por %p1918_p8, %p1917_p12 }
  0x75   : > { %p1920_p9 = pnand %p1919_p5, %p1913_p10 }
  0x77   : > { %1923 = shalt.err (!%p1920_p9)
}
  0x78   : > { %1723 = dma.hbm_to_vmem [thread:$0]  (!%p2274_p11), %s2270_s1, 256, %s2278_s14, %s2173_s17, %s2520_s15, %s2520_s15, %s2519_s19  }
  0x79   : > { %p2526_p6 = scmp.ne.s32.totalorder %s2515_s8, 0 }
  0x7a   : > { %s390_s22 = sand.u32 (!%p2526_p6), 1, %s2010_s9   ;;  %p2527_p9 = scmp.ne.s32.totalorder (!%p2526_p6), %s2509_s18, 0 }
  0x7b   : > { %388 = sbr.rel (%p2526_p6) target bundleno = 2294 (0x8f6), region = 52  ;;  %s2305_s21 = sshll.u32 (!%p2526_p6), %s390_s22, 3 }
  0x7c   : > { %s391_s25 = scalar_lea.sflag (!%p2526_p6), [#allocation8], %s390_s22  ;;  %s394_s4 = scalar_lea.vmem (!%p2526_p6), [#allocation7], %s2305_s21 }
  0x80   : > { %1977 = dma.done.wait (%p2527_p9), %s391_s25, 128  }
  0x81   : > { %1979 = vsyncadd (%p2527_p9), %s391_s25, 4294967168  ;;  %s399_s1 = sand.u32 1, %s2118_s12   ;;  %s403_s8 = scalar_lea.vmem [#allocation10], %s2305_s21 }
  0x82   : > { %s400_s17 = scalar_lea.sflag [#allocation11], %s399_s1 }
  0x83   : > { %1981 = dma.done.wait (%p2527_p9), %s400_s17, 128  }
  0x84   : > { %1983 = vsyncadd (%p2527_p9), %s400_s17, 4294967168  ;;  %s410_s19 = sand.u32 1, %s1998_s28   ;;  %p2528_p5 = scmp.ne.s32.totalorder %s2523_s20, 0 }
  0x85   : > { %s2319_s15 = sshll.u32 %s410_s19, 4 }
  0x86   : > { %s412_s14 = scalar_lea.vmem [#allocation12], %s2319_s15 }
  0x87   : > { %1985 = dma.done.wait (%p2528_p5), %s400_s17, 256  }
  0x88   : > { %1987 = vsyncadd (%p2528_p5), %s400_s17, 4294967040  ;;  %p468_p11 = scmp.lt.s32.totalorder %s2118_s12, 1  ;;  %p1540_p0 = scmp.ne.s32.totalorder %s2118_s12, 0 }
  0x8a   : > { %s469_s24 = scalar_select %p468_p11, %s2118_s12, 1 }
  0x8b   : > { %497 = sbr.rel (%p1540_p0) target bundleno = 315 (0x13b), region = 68 }
  0x8c   : > { %s2543_s24 = smov (!%p468_p11, %s469_s24), 1 }
  0x8d   : > { %s1586_s26 = sshll.u32 %s2543_s24, 4 }
  0x8e   : > { %s2331_s30 = scalar_lea.vmem %s2489_s3, %s1586_s26 }
  0x90   : > { %v498_v0 = vld [vmem:[%s2486_s0] sm:$0xff]  ;;  %vm503_vm0 = vcmask 261120   ;;  %v499_v1 = vld [vmem:[%s2486_s0 + $0x8] sm:$0xff]  ;;  %vm535_vm1 = vcmask 257024  }
  0x91   : > { %v501_v2 = vmul.f32 %v498_v0, %v498_v0  ;;  %538 = vst.msk [vmem:[#allocation5] sm:$0xff] %vm503_vm0, %v498_v0  ;;  %v502_v3 = vmul.f32 %v499_v1, %v499_v1  ;;  %539 = vst.msk [vmem:[#allocation5 + $0x8] sm:$0xff] %vm503_vm0, %v499_v1  ;;  %v1541_v13 = vld [vmem:[%s2488_s2] ss:$0 sm:$0xff] }
  0x93   : > { %v504_v4 = vsel %vm503_vm0, %v501_v2, 0.0  ;;  %v507_v5 = vsel %vm503_vm0, %v502_v3, 0.0 }
  0x94   : > { %505 = vadd.xlane.f32.xlu0 %v504_v4 }
  0x98   : > { %508 = vadd.xlane.f32.xlu0 %v507_v5 }
 0x11d   : > { %v506_v6 = vpop.xlane.xlu0 %505 }
 0x11e   : > { %v511_v7 = vmul.f32 0.03125, %v506_v6 }
 0x120   : > { %v513_v8 = vadd.f32 1e-06, %v511_v7 }
 0x121   : > { %v509_v9 = vpop.xlane.xlu0 %508 }
 0x122   : > { %1799 = vrsqrt.f32 %v513_v8  ;;  %v512_v10 = vmul.f32 0.03125, %v509_v9 }
 0x124   : > { %v514_v11 = vadd.f32 1e-06, %v512_v10 }
 0x126   : > { %1801 = vrsqrt.f32 %v514_v11 }
 0x12f   : > { %v1800_v12 = vpop.eup %1799 }
 0x130   : > { %v517_v14 = vmul.f32 %v1800_v12, %v498_v0 }
 0x132   : > { %v525_v15 = vmul.f32 %v1541_v13, %v517_v14 }
 0x133   : > { %v1802_v16 = vpop.eup %1801 }
 0x134   : > { %v1587_v17 = vpack.c.bf16 %v525_v15, %v525_v15  ;;  %v518_v18 = vmul.f32 %v1802_v16, %v499_v1 }
 0x136   : > { %536 = vst.msk [vmem:[#allocation2] sm:$0xf] %vm535_vm1, %v1587_v17  ;;  %v526_v19 = vmul.f32 %v1541_v13, %v518_v18 }
 0x138   : > { %v1588_v20 = vpack.c.bf16 %v526_v19, %v526_v19 }
 0x13a   : > { %537 = vst.msk [vmem:[#allocation2 + $0x4] sm:$0xf] %vm535_vm1, %v1588_v20 }
 0x13b PF: > { %p1544_p2 = scmp.ge.s32.totalorder %s2118_s12, 2 }
 0x13c   : > { %s2027_s17 = smov (!%p1544_p2), 120   ;;  %s2028_s19 = smov (!%p1544_p2), 112  }
 0x13d   : > { %543 = sbr.rel (%p1544_p2) target bundleno = 1562 (0x61a), region = 72  ;;  %s2029_s24 = smov (!%p1544_p2), 104  }
 0x13e   : > { %s2030_s26 = smov (!%p1544_p2), 96   ;;  %s2032_s18 = smov (!%p1544_p2), 8  }
 0x142   : > { %v1803_v21 = vld [vmem:[%s2331_s30 + $0x8] sm:$0xff]   ;;  %v2025_v22 = vmov 0.0   ;;  %v1804_v23 = vld [vmem:[%s2331_s30] sm:$0xff]   ;;  %vm2026_vm2 = vmmov 0   ;;  %vm567_vm3 = vcmask 261120   ;;  %vm620_vm4 = vcmask 388096  }
 0x143   : > { %1622 = vmatprep.subr.bf16.mxu0 %v2025_v22  ;;  %1630 = vmatprep.subr.bf16.mxu1 %v2025_v22  ;;  %v1805_v24 = vld [vmem:[#allocation2] sm:$0xff]   ;;  %vm631_vm5 = vcmask 64512   ;;  %vm693_vm6 = vcmask 1043456   ;;  %vm857_vm7 = vcmask 130048  }
 0x144   : > { %1623 = vmatpush3.bf16.msra.mxu0 %v1803_v21  ;;  %1626 = vmatprep.mubr.msk.bf16.mxu0 %vm2026_vm2, %v2025_v22  ;;  %v624_v47 = vld [vmem:[%s394_s4] sm:$0xff]  }
 0x145   : > { %1624 = vmatprep.subr.bf16.mxu0 %v2025_v22  ;;  %1632 = vmatprep.mubr.msk.bf16.mxu1 %vm2026_vm2, %v2025_v22  ;;  %v625_v48 = vunpack.c.l.bf16 %v624_v47  ;;  %v741_v54 = vunpack.c.h.bf16 %v624_v47  ;;  %v860_v59 = vld [vmem:[%s394_s4] sm:$0xff]   ;;  %s2031_s4 = smov 88  }
 0x146   : > { %v861_v62 = vunpack.c.l.bf16 %v860_v59  ;;  %v974_v5 = vunpack.c.h.bf16 %v860_v59 }
 0x148   : > { %1625 = vmatpush3.bf16.msra.mxu0 %v1804_v23 }
 0x149   : > { %1636 = vmatprep.subr.bf16.mxu0 %v2025_v22 }
 0x14b   : > { %1627 = vmatmul.mubr.msk.bf16.vlgmr.msra.gmra.mxu0 %vm567_vm3, %v1805_v24 }
 0x14c   : > { %1638 = vmatprep.mubr.msk.bf16.mxu0 %vm2026_vm2, %v2025_v22 }
 0x20b   : > { %v605_v25 = vpop.f32.mrf.mxu0 }
 0x20c   : > { %v1589_v26 = vpack.c.bf16 %v605_v25, %v605_v25 }
 0x20d   : > { %v1628_v27 = vpop.f32.mrf.mxu0 }
 0x20e   : > { %621 = vst.msk [vmem:[#allocation3] sm:$0xf] %vm620_vm4, %v1589_v26 }
 0x20f   : > { %v608_v28 = vpop.f32.mrf.mxu0 }
 0x210   : > { %v1590_v29 = vpack.c.bf16 %v608_v28, %v608_v28 }
 0x211   : > { %v1629_v30 = vpop.f32.mrf.mxu0 }
 0x212   : > { %622 = vst.msk [vmem:[#allocation3 + $0x4] sm:$0xf] %vm620_vm4, %v1590_v29 }
 0x215   : > { %v623_v31 = vld [vmem:[#allocation3] sm:$0xf] }
 0x216   : > { %v2357_v32 = vcombine.low %v623_v31, %v623_v31 }
 0x218   : > { %742 = vrot.lane.b32.xlu1 %v2357_v32, %s2027_s17  ;;  %629 = vrot.lane.b32.xlu0 %v2357_v32, %s2028_s19 }
 0x219   : > { %v859_v33 = vld [vmem:[#allocation3 + $0x4] sm:$0xf] }
 0x21a   : > { %v2361_v34 = vcombine.low %v859_v33, %v859_v33 }
 0x21c   : > { %744 = vrot.lane.b32.xlu0 %v2357_v32, %s2029_s24  ;;  %865 = vrot.lane.b32.xlu1 %v2361_v34, %s2028_s19 }
 0x220   : > { %977 = vrot.lane.b32.xlu0 %v2361_v34, %s2029_s24  ;;  %975 = vrot.lane.b32.xlu1 %v2361_v34, %s2027_s17 }
 0x224   : > { %688 = vrot.lane.b32.xlu1 %v2357_v32, %s2030_s26 }
 0x28a   : > { %v743_v35 = vpop.permute.xlu1 %742  ;;  %v630_v36 = vpop.permute.xlu0 %629 }
 0x28b   : > { %v636_v37 = vsel %vm631_vm5, %v630_v36, 0 }
 0x28c   : > { %1631 = vmatpush3.bf16.xpose.msra.mxu1 %v636_v37 }
 0x28d   : > { %1642 = vmatprep.subr.bf16.mxu1 %v2025_v22 }
 0x28e   : > { %v866_v38 = vpop.permute.xlu1 %865  ;;  %v745_v39 = vpop.permute.xlu0 %744 }
 0x28f   : > { %v750_v41 = vsel %vm631_vm5, %v745_v39, 0  ;;  %v871_v44 = vsel %vm631_vm5, %v866_v38, 0 }
 0x292   : > { %v976_v40 = vpop.permute.xlu1 %975  ;;  %v978_v45 = vpop.permute.xlu0 %977 }
 0x293   : > { %1633 = vmatmul.mubr.msk.bf16.vlgmr.msra.gmra.mxu1 %vm631_vm5, %v623_v31  ;;  %v983_v46 = vsel %vm631_vm5, %v978_v45, 0 }
 0x294   : > { %1643 = vmatpush3.bf16.xpose.msra.mxu1 %v750_v41  ;;  %1644 = vmatprep.mubr.msk.bf16.mxu1 %vm2026_vm2, %v2025_v22 }
 0x295   : > { %1654 = vmatprep.subr.bf16.mxu1 %v2025_v22 }
 0x296   : > { %v689_v42 = vpop.permute.xlu1 %688 }
 0x297   : > { %v695_v43 = vsel %vm693_vm6, %v689_v42, 0 }
 0x298   : > { %1637 = vmatpush3.bf16.msra.mxu0 %v695_v43 }
 0x299   : > { %1648 = vmatprep.subr.bf16.mxu0 %v2025_v22 }
 0x29b   : > { %1645 = vmatmul.mubr.msk.bf16.vlgmr.msra.gmra.mxu1 %vm631_vm5, %v743_v35 }
 0x29c   : > { %1655 = vmatpush3.bf16.xpose.msra.mxu1 %v871_v44  ;;  %1656 = vmatprep.mubr.msk.bf16.mxu1 %vm2026_vm2, %v2025_v22 }
 0x29d   : > { %1666 = vmatprep.subr.bf16.mxu1 %v2025_v22 }
 0x2a3   : > { %1657 = vmatmul.mubr.msk.bf16.vlgmr.msra.gmra.mxu1 %vm631_vm5, %v859_v33 }
 0x2a4   : > { %1667 = vmatpush3.bf16.xpose.msra.mxu1 %v983_v46  ;;  %1668 = vmatprep.mubr.msk.bf16.mxu1 %vm2026_vm2, %v2025_v22 }
 0x2a5   : > { %1678 = vmatprep.subr.bf16.mxu1 %v2025_v22 }
 0x2ab   : > { %1669 = vmatmul.mubr.msk.bf16.vlgmr.msra.gmra.mxu1 %vm631_vm5, %v976_v40 }
 0x2ac   : > { %1680 = vmatprep.mubr.msk.bf16.mxu1 %vm2026_vm2, %v2025_v22 }
 0x353   : > { %v672_v49 = vpop.f32.mrf.mxu1 }
 0x354   : > { %v673_v50 = vadd.f32 %v672_v49, %v625_v48 }
 0x355   : > { %v1634_v51 = vpop.f32.mrf.mxu1 }
 0x356   : > { %v678_v52 = vsel %vm631_vm5, %v673_v50, -inf }
 0x357   : > { %v675_v53 = vpop.f32.mrf.mxu1  ;;  %679 = vmax.xlane.f32.xlu0 %v678_v52 }
 0x359   : > { %v1635_v55 = vpop.f32.mrf.mxu1 }
 0x35a   : > { %v1808_v55 = vld [vmem:[%s403_s8] sm:$0xff]  }
 0x35b   : > { %v786_v56 = vpop.f32.mrf.mxu1  ;;  %1679 = vmatpush3.bf16.msra.mxu1 %v1808_v55 }
 0x35c   : > { %v787_v57 = vadd.f32 %v786_v56, %v741_v54 }
 0x35d   : > { %v1646_v58 = vpop.f32.mrf.mxu1 }
 0x35e   : > { %v792_v60 = vsel %vm631_vm5, %v787_v57, -inf }
 0x35f   : > { %v789_v61 = vpop.f32.mrf.mxu1  ;;  %793 = vmax.xlane.f32.xlu1 %v792_v60 }
 0x361   : > { %v1647_v63 = vpop.f32.mrf.mxu1 }
 0x363   : > { %v907_v0 = vpop.f32.mrf.mxu1 }
 0x364   : > { %v908_v1 = vadd.f32 %v907_v0, %v861_v62 }
 0x365   : > { %v1658_v2 = vpop.f32.mrf.mxu1 }
 0x366   : > { %v913_v3 = vsel %vm631_vm5, %v908_v1, -inf }
 0x367   : > { %914 = vmax.xlane.f32.xlu0 %v913_v3  ;;  %v910_v4 = vpop.f32.mrf.mxu1 }
 0x369   : > { %v1659_v6 = vpop.f32.mrf.mxu1 }
 0x36b   : > { %v1019_v7 = vpop.f32.mrf.mxu1 }
 0x36c   : > { %v1020_v8 = vadd.f32 %v1019_v7, %v974_v5 }
 0x36d   : > { %v1670_v9 = vpop.f32.mrf.mxu1 }
 0x36e   : > { %v1025_v10 = vsel %vm631_vm5, %v1020_v8, -inf }
 0x36f   : > { %1026 = vmax.xlane.f32.xlu0 %v1025_v10  ;;  %v1022_v11 = vpop.f32.mrf.mxu1 }
 0x370   : > { %923 = vrot.lane.b32.xlu1 %v2361_v34, %s2030_s26 }
 0x371   : > { %v1671_v12 = vpop.f32.mrf.mxu1 }
 0x374   : > { %1035 = vrot.lane.b32.xlu1 %v2361_v34, %s2031_s4 }
 0x385   : > { %802 = vrot.lane.b32.xlu0 %v2357_v32, %s2031_s4 }
 0x3e0   : > { %v680_v13 = vpop.xlane.xlu0 %679 }
 0x3e1   : > { %v681_v14 = vsub.f32 %v673_v50, %v680_v13 }
 0x3e3   : > { %v682_v15 = vmul.f32 1.442695, %v681_v14 }
 0x3e5   : > { %1809 = vpow2.f32 %v682_v15  ;;  %v1091_v15 = vld [vmem:[#allocation5] sm:$0xff] }
 0x3e8   : > { %v794_v16 = vpop.xlane.xlu1 %793 }
 0x3e9   : > { %v795_v17 = vsub.f32 %v787_v57, %v794_v16 }
 0x3eb   : > { %v796_v18 = vmul.f32 1.442695, %v795_v17 }
 0x3ec   : > { %v924_v32 = vpop.permute.xlu1 %923 }
 0x3ed   : > { %1811 = vpow2.f32 %v796_v18  ;;  %v929_v35 = vsel %vm693_vm6, %v924_v32, 0 }
 0x3f0   : > { %v915_v19 = vpop.xlane.xlu0 %914  ;;  %v1036_v38 = vpop.permute.xlu1 %1035 }
 0x3f1   : > { %v916_v20 = vsub.f32 %v908_v1, %v915_v19  ;;  %v1041_v40 = vsel %vm693_vm6, %v1036_v38, 0  ;;  %v1092_v19 = vld [vmem:[#allocation5 + $0x8] sm:$0xff] }
 0x3f2   : > { %v1810_v21 = vpop.eup %1809 }
 0x3f3   : > { %v917_v23 = vmul.f32 1.442695, %v916_v20  ;;  %v687_v24 = vpack.c.bf16 %v1810_v21, %v1810_v21  ;;  %v684_v33 = vsel %vm631_vm5, %v1810_v21, 0.0 }
 0x3f5   : > { %1813 = vpow2.f32 %v917_v23  ;;  %1639 = vmatmul.mubr.msk.bf16.vlgmr.msra.gmra.mxu0 %vm631_vm5, %v687_v24 }
 0x3f6   : > { %1650 = vmatprep.mubr.msk.bf16.mxu0 %vm2026_vm2, %v2025_v22 }
 0x3f8   : > { %v1027_v25 = vpop.xlane.xlu0 %1026 }
 0x3f9   : > { %v1028_v26 = vsub.f32 %v1020_v8, %v1027_v25 }
 0x3fa   : > { %v1812_v27 = vpop.eup %1811 }
 0x3fb   : > { %v1029_v28 = vmul.f32 1.442695, %v1028_v26  ;;  %v798_v29 = vsel %vm631_vm5, %v1812_v27, 0.0  ;;  %v801_v34 = vpack.c.bf16 %v1812_v27, %v1812_v27 }
 0x3fc   : > { %v803_v30 = vpop.permute.xlu0 %802  ;;  %799 = vadd.xlane.f32.xlu0 %v798_v29 }
 0x3fd   : > { %1815 = vpow2.f32 %v1029_v28  ;;  %v808_v31 = vsel %vm693_vm6, %v803_v30, 0 }
 0x3fe   : > { %1649 = vmatpush3.bf16.msra.mxu0 %v808_v31 }
 0x3ff   : > { %1660 = vmatprep.subr.bf16.mxu0 %v2025_v22 }
 0x400   : > { %685 = vadd.xlane.f32.xlu0 %v684_v33 }
 0x401   : > { %1651 = vmatmul.mubr.msk.bf16.vlgmr.msra.gmra.mxu0 %vm631_vm5, %v801_v34 }
 0x402   : > { %v1814_v36 = vpop.eup %1813  ;;  %1661 = vmatpush3.bf16.msra.mxu0 %v929_v35  ;;  %1662 = vmatprep.mubr.msk.bf16.mxu0 %vm2026_vm2, %v2025_v22 }
 0x403   : > { %v919_v37 = vsel %vm631_vm5, %v1814_v36, 0.0  ;;  %1672 = vmatprep.subr.bf16.mxu0 %v2025_v22  ;;  %v922_v39 = vpack.c.bf16 %v1814_v36, %v1814_v36 }
 0x404   : > { %920 = vadd.xlane.f32.xlu0 %v919_v37 }
 0x409   : > { %1663 = vmatmul.mubr.msk.bf16.vlgmr.msra.gmra.mxu0 %vm631_vm5, %v922_v39 }
 0x40a   : > { %v1816_v41 = vpop.eup %1815  ;;  %1673 = vmatpush3.bf16.msra.mxu0 %v1041_v40  ;;  %1674 = vmatprep.mubr.msk.bf16.mxu0 %vm2026_vm2, %v2025_v22 }
 0x40b   : > { %v1031_v42 = vsel %vm631_vm5, %v1816_v41, 0.0  ;;  %v1034_v43 = vpack.c.bf16 %v1816_v41, %v1816_v41 }
 0x40c   : > { %1032 = vadd.xlane.f32.xlu1 %v1031_v42 }
 0x411   : > { %1675 = vmatmul.mubr.msk.bf16.vlgmr.msra.gmra.mxu0 %vm631_vm5, %v1034_v43 }
 0x485   : > { %v800_v44 = vpop.xlane.xlu0 %799 }
 0x486   : > { %1817 = vrcp.f32 %v800_v44 }
 0x489   : > { %v686_v2 = vpop.xlane.xlu0 %685 }
 0x48d   : > { %v921_v4 = vpop.xlane.xlu0 %920 }
 0x493   : > { %v1818_v49 = vpop.eup %1817 }
 0x495   : > { %v1033_v50 = vpop.xlane.xlu1 %1032 }
 0x496   : > { %1819 = vrcp.f32 %v1033_v50 }
 0x497   : > { %1821 = vrcp.f32 %v686_v2 }
 0x498   : > { %1823 = vrcp.f32 %v921_v4 }
 0x4a3   : > { %v1820_v60 = vpop.eup %1819 }
 0x4a4   : > { %v1822_v3 = vpop.eup %1821 }
 0x4a5   : > { %v1824_v8 = vpop.eup %1823 }
 0x4b5   : > { %v731_v45 = vpop.f32.mrf.mxu0 }
 0x4b6   : > { %v738_v5 = vmul.f32 %v1822_v3, %v731_v45 }
 0x4b7   : > { %v1640_v46 = vpop.f32.mrf.mxu0 }
 0x4b9   : > { %v734_v47 = vpop.f32.mrf.mxu0 }
 0x4bb   : > { %v1641_v48 = vpop.f32.mrf.mxu0 }
 0x4c1   : > { %v844_v51 = vpop.f32.mrf.mxu0 }
 0x4c2   : > { %v851_v52 = vmul.f32 %v1818_v49, %v844_v51 }
 0x4c3   : > { %v1652_v53 = vpop.f32.mrf.mxu0 }
 0x4c4   : > { %853 = vrot.lane.b32.xlu1 %v851_v52, %s2032_s18 }
 0x4c5   : > { %v847_v22 = vpop.f32.mrf.mxu0 }
 0x4c7   : > { %v1653_v54 = vpop.f32.mrf.mxu0 }
 0x4c9   : > { %v965_v56 = vpop.f32.mrf.mxu0 }
 0x4ca   : > { %v972_v9 = vmul.f32 %v1824_v8, %v965_v56 }
 0x4cb   : > { %v1664_v57 = vpop.f32.mrf.mxu0 }
 0x4cd   : > { %v968_v58 = vpop.f32.mrf.mxu0 }
 0x4cf   : > { %v1665_v59 = vpop.f32.mrf.mxu0 }
 0x4d1   : > { %v1077_v61 = vpop.f32.mrf.mxu0 }
 0x4d2   : > { %v1084_v62 = vmul.f32 %v1820_v60, %v1077_v61 }
 0x4d3   : > { %v1676_v63 = vpop.f32.mrf.mxu0 }
 0x4d4   : > { %1086 = vrot.lane.b32.xlu0 %v1084_v62, %s2032_s18 }
 0x4d5   : > { %v1080_v0 = vpop.f32.mrf.mxu0 }
 0x4d7   : > { %v1677_v1 = vpop.f32.mrf.mxu0 }
 0x536   : > { %v854_v6 = vpop.permute.xlu1 %853 }
 0x537   : > { %v856_v7 = vsel %vm631_vm5, %v738_v5, %v854_v6 }
 0x538   : > { %858 = vst.msk [vmem:[#allocation4] sm:$0xff] %vm857_vm7, %v856_v7 }
 0x53f   : > { %v1093_v12 = vld [vmem:[#allocation4] sm:$0xff] }
 0x546   : > { %v1087_v10 = vpop.permute.xlu0 %1086 }
 0x547   : > { %v1089_v11 = vsel %vm631_vm5, %v972_v9, %v1087_v10 }
 0x548   : > { %1090 = vst.msk [vmem:[#allocation4 + $0x8] sm:$0xff] %vm857_vm7, %v1089_v11 }
 0x54f   : > { %v1094_v13 = vld [vmem:[#allocation4 + $0x8] sm:$0xff] }
 0x550   : > { %v1095_v14 = vpack.c.bf16 %v1094_v13, %v1093_v12 }
 0x552   : > { %1681 = vmatmul.mubr.msk.bf16.vlgmr.msra.gmra.mxu1 %vm857_vm7, %v1095_v14 }
 0x612   : > { %v1141_v16 = vpop.f32.mrf.mxu1 }
 0x613   : > { %v1148_v17 = vadd.f32 %v1141_v16, %v1091_v15 }
 0x614   : > { %v1682_v18 = vpop.f32.mrf.mxu1 }
 0x615   : > { %1150 = vst.msk [vmem:[#allocation5] sm:$0xff] %vm567_vm3, %v1148_v17 }
 0x616   : > { %v1144_v20 = vpop.f32.mrf.mxu1 }
 0x617   : > { %v1149_v21 = vadd.f32 %v1144_v20, %v1092_v19 }
 0x618   : > { %v1683_v23 = vpop.f32.mrf.mxu1 }
 0x619   : > { %1151 = vst.msk [vmem:[#allocation5 + $0x8] sm:$0xff] %vm567_vm3, %v1149_v21 }
 0x61a PF: > { %p1565_p7 = scmp.ne.s32.totalorder %s2118_s12, 1 }
 0x61c   : > { %1155 = sbr.rel (%p1565_p7) target bundleno = 1740 (0x6cc), region = 76 }
 0x621   : > { %v1156_v24 = vld [vmem:[#allocation5] sm:$0xff]  ;;  %vm1161_vm8 = vcmask 261120   ;;  %v1157_v25 = vld [vmem:[#allocation5 + $0x8] sm:$0xff]  ;;  %vm1193_vm9 = vcmask 257024  }
 0x622   : > { %v1159_v26 = vmul.f32 %v1156_v24, %v1156_v24  ;;  %v1160_v27 = vmul.f32 %v1157_v25, %v1157_v25  ;;  %v1566_v37 = vld [vmem:[%s2491_s5] ss:$0 sm:$0xff] }
 0x624   : > { %v1162_v28 = vsel %vm1161_vm8, %v1159_v26, 0.0  ;;  %v1165_v29 = vsel %vm1161_vm8, %v1160_v27, 0.0 }
 0x625   : > { %1163 = vadd.xlane.f32.xlu0 %v1162_v28 }
 0x629   : > { %1166 = vadd.xlane.f32.xlu0 %v1165_v29 }
 0x6ae   : > { %v1164_v30 = vpop.xlane.xlu0 %1163 }
 0x6af   : > { %v1169_v31 = vmul.f32 0.03125, %v1164_v30 }
 0x6b1   : > { %v1171_v32 = vadd.f32 1e-06, %v1169_v31 }
 0x6b2   : > { %v1167_v33 = vpop.xlane.xlu0 %1166 }
 0x6b3   : > { %1825 = vrsqrt.f32 %v1171_v32  ;;  %v1170_v34 = vmul.f32 0.03125, %v1167_v33 }
 0x6b5   : > { %v1172_v35 = vadd.f32 1e-06, %v1170_v34 }
 0x6b7   : > { %1827 = vrsqrt.f32 %v1172_v35 }
 0x6c0   : > { %v1826_v36 = vpop.eup %1825 }
 0x6c1   : > { %v1175_v38 = vmul.f32 %v1826_v36, %v1156_v24 }
 0x6c3   : > { %v1183_v39 = vmul.f32 %v1566_v37, %v1175_v38 }
 0x6c4   : > { %v1828_v40 = vpop.eup %1827 }
 0x6c5   : > { %v1591_v41 = vpack.c.bf16 %v1183_v39, %v1183_v39  ;;  %v1176_v42 = vmul.f32 %v1828_v40, %v1157_v25 }
 0x6c7   : > { %1194 = vst.msk [vmem:[#allocation6] sm:$0xf] %vm1193_vm9, %v1591_v41  ;;  %v1184_v43 = vmul.f32 %v1566_v37, %v1176_v42 }
 0x6c9   : > { %v1592_v44 = vpack.c.bf16 %v1184_v43, %v1184_v43 }
 0x6cb   : > { %1195 = vst.msk [vmem:[#allocation6 + $0x4] sm:$0xf] %vm1193_vm9, %v1592_v44 }
 0x6cc PF: > { %p1569_p13 = scmp.lt.s32.totalorder %s2118_s12, 2 }
 0x6cd   : > { %s2035_s25 = smov (!%p1569_p13), 64  }
 0x6ce   : > { %1199 = sbr.rel (%p1569_p13) target bundleno = 2272 (0x8e0), region = 80 }
 0x6d3   : > { %v1829_v45 = vld [vmem:[%s412_s14 + $0x8] sm:$0xff]   ;;  %v2033_v46 = vmov 0.0   ;;  %v1830_v47 = vld [vmem:[%s412_s14] sm:$0xff]   ;;  %vm2034_vm10 = vmmov 0   ;;  %vm1223_vm11 = vcmask 261120   ;;  %vm1329_vm12 = vcmask 523264  }
 0x6d4   : > { %1684 = vmatprep.subr.bf16.mxu0 %v2033_v46  ;;  %1692 = vmatprep.subr.bf16.mxu1 %v2033_v46  ;;  %v1831_v48 = vld [vmem:[#allocation6] sm:$0xff]   ;;  %v1832_v49 = vld [vmem:[%s2493_s7 + $0x18] sm:$0xff]   ;;  %v1834_v51 = vld [vmem:[%s2493_s7 + $0x8] sm:$0xff]  }
 0x6d5   : > { %1685 = vmatpush3.bf16.msra.mxu0 %v1829_v45  ;;  %1688 = vmatprep.mubr.msk.bf16.mxu0 %vm2034_vm10, %v2033_v46  ;;  %v1833_v50 = vld [vmem:[%s2493_s7 + $0x10] sm:$0xff]   ;;  %v1835_v52 = vld [vmem:[%s2493_s7] sm:$0xff]   ;;  %v1375_v19 = vld [vmem:[#allocation5 + $0x8] sm:$0xff] }
 0x6d6   : > { %1686 = vmatprep.subr.bf16.mxu0 %v2033_v46  ;;  %1700 = vmatprep.mubr.msk.bf16.mxu1 %vm2034_vm10, %v2033_v46  ;;  %v1374_v15 = vld [vmem:[#allocation5] sm:$0xff] }
 0x6d7   : > { %1693 = vmatpush3.bf16.msra.mxu1 %v1832_v49 }
 0x6d8   : > { %1694 = vmatprep.subr.bf16.mxu1 %v2033_v46 }
 0x6d9   : > { %1687 = vmatpush3.bf16.msra.mxu0 %v1830_v47 }
 0x6db   : > { %1695 = vmatpush3.bf16.msra.mxu1 %v1833_v50 }
 0x6dc   : > { %1689 = vmatmul.mubr.msk.bf16.vlgmr.msra.gmra.mxu0 %vm1223_vm11, %v1831_v48  ;;  %1696 = vmatprep.subr.bf16.mxu1 %v2033_v46 }
 0x6df   : > { %1697 = vmatpush3.bf16.msra.mxu1 %v1834_v51 }
 0x6e0   : > { %1698 = vmatprep.subr.bf16.mxu1 %v2033_v46 }
 0x6e3   : > { %1699 = vmatpush3.bf16.msra.mxu1 %v1835_v52 }
 0x79c   : > { %v1261_v53 = vpop.f32.mrf.mxu0 }
 0x79d   : > { %1288 = vrot.lane.b32.xlu0 %v1261_v53, %s2035_s25  ;;  %v1270_v56 = vmul.f32 0.044715, %v1261_v53  ;;  %v1268_v7 = vmul.f32 0.5, %v1261_v53 }
 0x79e   : > { %v1690_v22 = vpop.f32.mrf.mxu0 }
 0x79f   : > { %v1272_v58 = vmul.f32 %v1270_v56, %v1261_v53 }
 0x7a0   : > { %v1264_v54 = vpop.f32.mrf.mxu0 }
 0x7a1   : > { %1290 = vrot.lane.b32.xlu0 %v1264_v54, %s2035_s25  ;;  %v1271_v57 = vmul.f32 0.044715, %v1264_v54  ;;  %v1274_v60 = vmul.f32 %v1272_v58, %v1261_v53  ;;  %v1269_v8 = vmul.f32 0.5, %v1264_v54 }
 0x7a2   : > { %v1691_v55 = vpop.f32.mrf.mxu0 }
 0x7a3   : > { %v1273_v59 = vmul.f32 %v1271_v57, %v1264_v54  ;;  %v1276_v62 = vadd.f32 %v1274_v60, %v1261_v53 }
 0x7a5   : > { %v1275_v61 = vmul.f32 %v1273_v59, %v1264_v54  ;;  %v1278_v0 = vmul.f32 0.7978846, %v1276_v62 }
 0x7a7   : > { %v1277_v63 = vadd.f32 %v1275_v61, %v1264_v54  ;;  %1836 = vtanh.f32 %v1278_v0 }
 0x7a9   : > { %v1279_v1 = vmul.f32 0.7978846, %v1277_v63 }
 0x7ab   : > { %1838 = vtanh.f32 %v1279_v1 }
 0x7b4   : > { %v1837_v2 = vpop.eup %1836 }
 0x7b5   : > { %v1282_v4 = vadd.f32 1.0, %v1837_v2 }
 0x7b7   : > { %v1284_v9 = vmul.f32 %v1282_v4, %v1268_v7 }
 0x7b8   : > { %v1839_v3 = vpop.eup %1838 }
 0x7b9   : > { %v1283_v5 = vadd.f32 1.0, %v1839_v3 }
 0x7bb   : > { %v1285_v10 = vmul.f32 %v1283_v5, %v1269_v8 }
 0x80f   : > { %v1289_v6 = vpop.permute.xlu0 %1288 }
 0x810   : > { %v1294_v12 = vmul.f32 %v1289_v6, %v1284_v9 }
 0x813   : > { %v1291_v11 = vpop.permute.xlu0 %1290 }
 0x814   : > { %v1295_v13 = vmul.f32 %v1291_v11, %v1285_v10 }
 0x816   : > { %v1296_v14 = vpack.c.bf16 %v1295_v13, %v1294_v12 }
 0x818   : > { %1701 = vmatmul.mubr.msk.bf16.vlgmr.msra.gmra.mxu1 %vm1329_vm12, %v1296_v14 }
 0x8d8   : > { %v1367_v16 = vpop.f32.mrf.mxu1 }
 0x8d9   : > { %v1376_v17 = vadd.f32 %v1374_v15, %v1367_v16 }
 0x8da   : > { %v1702_v18 = vpop.f32.mrf.mxu1 }
 0x8db   : > { %1378 = vst.msk [vmem:[#allocation13] sm:$0xff] %vm1223_vm11, %v1376_v17 }
 0x8dc   : > { %v1370_v20 = vpop.f32.mrf.mxu1 }
 0x8dd   : > { %v1377_v21 = vadd.f32 %v1375_v19, %v1370_v20 }
 0x8de   : > { %v1703_v23 = vpop.f32.mrf.mxu1 }
 0x8df   : > { %1379 = vst.msk [vmem:[#allocation13 + $0x8] sm:$0xff] %vm1223_vm11, %v1377_v21 }
 0x8e0 PF: > { %p1725_p1 = scmp.eq.s32.totalorder %s2118_s12, 2  ;;  %s2036_s1 = smov [#allocation13]  }
 0x8e1   : > { %s1386_s17 = sshll.u32 %s2036_s1, 4  ;;  %s1387_s17 = int_to_ptr.vmem [resolvable:$true] %s1386_s17 }
 0x8e2   : > { %s1924_s19 = scalar_lea.vmem %s1387_s17, 256  ;;  %p1931_p12 = scmp.lt.s32.totalorder %s1387_s17, %s1387_s17 }
 0x8e3   : > { %p1925_p4 = scmp.ne.s32.totalorder %s1387_s17, %s1924_s19  ;;  %p1932_p8 = scmp.lt.s32.totalorder %s1924_s19, %s1924_s19 }
 0x8e5   : > { %p1926_p3 = pnand %p1925_p4, %p1725_p1  ;;  %p1933_p6 = por %p1932_p8, %p1931_p12 }
 0x8e7   : > { %p1927_p10 = pneg %p1926_p3 }
 0x8e9   : > { %p1934_p9 = pnand %p1933_p6, %p1927_p10 }
 0x8eb   : > { %1937 = shalt.err (!%p1934_p9)
}
 0x8ec   : > { %s2037_s24 = smov 128   ;;  %s2038_s26 = smov 8  }
 0x8ed   : > { %s2529_s21 = sld [smem:[#allocation21_spill]] }
 0x8f3   : > { %1711 = dma.vmem_to_hbm [thread:$0]  (%p1725_p1), %s1387_s17, 256, %s2529_s21, [#allocation9], %s2037_s24, %s2037_s24, %s2038_s26  }
 0x8f4   : > { %1989 = dma.done.wait (%p1725_p1), [#allocation9], 256  }
 0x8f5   : > { %1991 = vsyncadd (%p1725_p1), [#allocation9], 4294967040 }
 0x8f6 PF: > { %s2530_s8 = sld [smem:[#allocation18_spill]]  ;;  %p22_p5 = scmp.ge.s32.totalorder %s2121_s13, 5  }
 0x8f7   : > { %s2531_s27 = smov %s1998_s28  ;;  %s2532_s28 = smov %s2002_s29 }
 0x8f8   : > { %s2533_s29 = smov %s2265_s16  ;;  %s2534_s30 = smov %s2010_s9 }
 0x8f9   : > { %s2535_s9 = smov %s2014_s10  ;;  %s2537_s11 = smov %s2121_s13 }
 0x8fa   :  { %24 = sbr.rel (!%p22_p5) target bundleno = 12 (0xc), region = 136 }
 0x8fc   : > { %s2536_s10 = smov %s2530_s8 }
 0x8ff   :  { %1402 = vsyncpa [#allocation8], 1 }
 0x900   :  { %1404 = vsyncpa [#allocation8 + $0x1], 1 }
 0x901   :  { %1405 = vsyncpa [#allocation11], 1 }
 0x902   :  { %1407 = vsyncpa [#allocation11 + $0x1], 1 }
 0x903   :  { %1408 = vsyncpa [#allocation9], 1 }
 0x904   :  { %1410 = vsyncpa [#allocation9 + $0x1], 1 }

</bundles_post_ra>
